<compile_context>
chip_gen: v5e
topology: v5e:2x2
jax: 0.10.0
libtpu: 0.0.40
codegen_flags: <defaults>
</compile_context>

<pallas_src>
import functools

import jax
import jax.numpy as jnp
from jax.experimental import pallas as pl
from jax.experimental.pallas import tpu as pltpu

_MXU_DTYPE = jnp.bfloat16
_STATE_DTYPE = jnp.bfloat16       # inter-kernel hidden-state dtype
_LN_EPS = 1e-12


# ----------------------------------------------------------------------------- #
# Hardware-aware knobs
# ----------------------------------------------------------------------------- #
@functools.lru_cache(maxsize=None)
def _vmem_limit_bytes():
    cap = 128 * 1024 * 1024
    try:
        cap = int(pltpu.get_tpu_info().vmem_capacity_bytes)
    except Exception:
        pass
    # ~75% of physical VMEM: 96 MiB on v5e/v6e, 48 MiB on v7x.
    return max(32 * 1024 * 1024, (cap * 3) // 4)


def _row_tile(M):
    # Smaller row tiles on chips with less VMEM (v7x: 64 MiB physical).
    pref = 512 if _vmem_limit_bytes() >= 64 * 1024 * 1024 else 256
    return M if M <= pref else pref


def _ffn_chunk(I):
    if I <= 1024:
        return I
    for c in (1024, 512, 256, 128):
        if I % c == 0:
            return c
    return I


def _cparams(n_grid_dims):
    return pltpu.CompilerParams(
        dimension_semantics=("parallel",) * n_grid_dims,
        vmem_limit_bytes=_vmem_limit_bytes())


def _single_buffered():
    for make in (lambda: pl.Buffered(1), lambda: pl.Buffered(buffer_count=1)):
        try:
            return make()
        except Exception:
            pass
    return None


_REP_PIPELINE_MODE = _single_buffered()


def _rep_spec(shape):
    """BlockSpec for a grid-invariant (replicated) block, single-buffered if possible."""
    nd = len(shape)
    if _REP_PIPELINE_MODE is None:
        return pl.BlockSpec(shape, lambda i: (0,) * nd)
    return pl.BlockSpec(shape, lambda i: (0,) * nd,
                        pipeline_mode=_REP_PIPELINE_MODE)


def _row_spec(tm, cols):
    return pl.BlockSpec((tm, cols), lambda i: (i, 0))


def _probe_single_buffering():
    """Fall back to default double-buffering if Buffered(1) is rejected by this build."""
    global _REP_PIPELINE_MODE
    if _REP_PIPELINE_MODE is None:
        return

    def k(w_ref, x_ref, o_ref):
        o_ref[...] = x_ref[...] + w_ref[...]

    try:
        out = pl.pallas_call(
            k,
            out_shape=jax.ShapeDtypeStruct((16, 128), jnp.float32),
            grid=(2,),
            in_specs=[_rep_spec((1, 128)), pl.BlockSpec((8, 128), lambda i: (i, 0))],
            out_specs=pl.BlockSpec((8, 128), lambda i: (i, 0)),
        )(jnp.zeros((1, 128), jnp.float32), jnp.zeros((16, 128), jnp.float32))
        jax.block_until_ready(out)
    except Exception:
        _REP_PIPELINE_MODE = None


def _pad_rows(x, tm):
    pad = (-x.shape[0]) % tm
    if pad:
        x = jnp.pad(x, ((0, pad), (0, 0)))
    return x


# ----------------------------------------------------------------------------- #
# In-kernel helpers (all f32 epilogue math)
# ----------------------------------------------------------------------------- #
def _gelu(x):
    # tanh-approximation GELU.
    # TODO(synk): HuggingFace BERT default is the exact erf-based GELU; the tanh
    # approximation differs by <1e-3 at these magnitudes.
    c = jnp.float32(0.7978845608028654)  # sqrt(2/pi)
    return 0.5 * x * (1.0 + jnp.tanh(c * (x + 0.044715 * x * x * x)))


def _layernorm(x, g, b, eps):
    mean = jnp.mean(x, axis=-1, keepdims=True)
    var = jnp.mean(jnp.square(x - mean), axis=-1, keepdims=True)
    return (x - mean) * jax.lax.rsqrt(var + eps) * g + b


# ----------------------------------------------------------------------------- #
# Pallas kernels
# ----------------------------------------------------------------------------- #
def _ln_kernel(x_ref, g_ref, b_ref, o_ref, *, eps):
    x = x_ref[...].astype(jnp.float32)
    o_ref[...] = _layernorm(x, g_ref[...], b_ref[...], eps).astype(o_ref.dtype)


def _fused_attn_kernel(x_ref, bias_ref, wqkv_ref, bqkv_ref, o_ref, *, num_heads, scale):
    # x_ref:    (1, S, H)  bf16   hidden states of this batch element
    # bias_ref: (1, 1, S)  f32    additive attention-mask bias
    # wqkv_ref: (H, 3H)    bf16   fused QKV weight (grid-invariant, single-buffered)
    # bqkv_ref: (1, 3H)    f32
    # o_ref:    (1, S, H)  bf16   attention context (single lane-dense store)
    x = x_ref[0]                                               # (S, H) bf16
    S, H = x.shape
    DH = H // num_heads
    qkv = jnp.dot(x, wqkv_ref[...],
                  preferred_element_type=jnp.float32) + bqkv_ref[...]   # (S, 3H) f32
    q = (qkv[:, :H] * scale).reshape(S, num_heads, DH).astype(_MXU_DTYPE)
    k = qkv[:, H:2 * H].reshape(S, num_heads, DH).astype(_MXU_DTYPE)
    v = qkv[:, 2 * H:].reshape(S, num_heads, DH).astype(_MXU_DTYPE)
    # batched per-head QK^T (contraction over DH) -- no explicit per-head transposes
    s = jnp.einsum("qhd,khd->hqk", q, k, preferred_element_type=jnp.float32)
    s = s + bias_ref[0]                                        # (NH, S, S) + (1, S)
    m = jnp.max(s, axis=-1, keepdims=True)
    p = jnp.exp(s - m)
    p = p * pl.reciprocal(jnp.sum(p, axis=-1, keepdims=True), approx=True)
    ctx = jnp.einsum("hqk,khd->qhd", p.astype(_MXU_DTYPE), v,
                     preferred_element_type=jnp.float32)       # (S, NH, DH)
    # TODO(synk): at long S flash-tile over kv blocks and grid over (B, heads/q-blocks)
    # for v7x's 2 TensorCores; whole-S per batch is fine at these sizes.
    o_ref[0] = ctx.reshape(S, H).astype(o_ref.dtype)


def _attn_out_ln_kernel(ctx_ref, res_ref, w_ref, b_ref, g_ref, beta_ref, o_ref, *, eps):
    y = jnp.dot(ctx_ref[...], w_ref[...], preferred_element_type=jnp.float32)
    y = y + b_ref[...] + res_ref[...].astype(jnp.float32)
    o_ref[...] = _layernorm(y, g_ref[...], beta_ref[...], eps).astype(o_ref.dtype)


def _ffn_ln_kernel(x_ref, wi_ref, bi_ref, wo_ref, bo_ref, g_ref, beta_ref,
                   o_ref, acc_ref, *, eps, chunk):
    # Chunk the GELU intermediate over I: the full (tm, I) f32 activation is never
    # materialized; the second matmul accumulates into an f32 VMEM scratch.
    x = x_ref[...]                                             # (tm, H) bf16
    n_chunks = wi_ref.shape[1] // chunk                        # static
    acc_ref[...] = jnp.zeros_like(acc_ref)
    for c in range(n_chunks):                                  # static offsets -> static ref slices
        j0, j1 = c * chunk, (c + 1) * chunk
        h = jnp.dot(x, wi_ref[:, j0:j1],
                    preferred_element_type=jnp.float32) + bi_ref[:, j0:j1]
        h = _gelu(h)
        acc_ref[...] += jnp.dot(h.astype(_MXU_DTYPE), wo_ref[j0:j1, :],
                                preferred_element_type=jnp.float32)
    y = acc_ref[...] + bo_ref[...] + x.astype(jnp.float32)
    o_ref[...] = _layernorm(y, g_ref[...], beta_ref[...], eps).astype(o_ref.dtype)


def _pooler_heads_kernel(cls_ref, wp_ref, bp_ref, wh_ref, bh_ref, o_ref):
    pooled = jnp.tanh(jnp.dot(cls_ref[...], wp_ref[...],
                              preferred_element_type=jnp.float32) + bp_ref[...])
    # TODO(synk): nn.Dropout(0.3) is identity in eval mode; no stochastic dropout here.
    o_ref[...] = (jnp.dot(pooled.astype(wh_ref.dtype), wh_ref[...],
                          preferred_element_type=jnp.float32)
                  + bh_ref[...]).astype(o_ref.dtype)


# ----------------------------------------------------------------------------- #
# pallas_call wrappers
# ----------------------------------------------------------------------------- #
def layernorm(x, g, b, eps=_LN_EPS):
    M, H = x.shape
    tm = _row_tile(M)
    xp = _pad_rows(x, tm)
    Mp = xp.shape[0]
    out = pl.pallas_call(
        functools.partial(_ln_kernel, eps=eps),
        out_shape=jax.ShapeDtypeStruct((Mp, H), _STATE_DTYPE),
        grid=(Mp // tm,),
        in_specs=[_row_spec(tm, H), _rep_spec((1, H)), _rep_spec((1, H))],
        out_specs=_row_spec(tm, H),
        compiler_params=_cparams(1),
    )(xp, g.reshape(1, H), b.reshape(1, H))
    return out[:M] if Mp != M else out


def fused_qkv_attention(x, mask_bias, w_qkv, b_qkv, num_heads, scale):
    # x: (B, S, H) bf16; mask_bias: (B, 1, S) f32; w_qkv: (H, 3H) bf16
    B, S, H = x.shape
    H3 = w_qkv.shape[1]
    return pl.pallas_call(
        functools.partial(_fused_attn_kernel, num_heads=num_heads, scale=scale),
        out_shape=jax.ShapeDtypeStruct((B, S, H), _STATE_DTYPE),
        grid=(B,),
        in_specs=[pl.BlockSpec((1, S, H), lambda b: (b, 0, 0)),
                  pl.BlockSpec((1, 1, S), lambda b: (b, 0, 0)),
                  _rep_spec((H, H3)),
                  _rep_spec((1, H3))],
        out_specs=pl.BlockSpec((1, S, H), lambda b: (b, 0, 0)),
        compiler_params=_cparams(1),
    )(x, mask_bias, w_qkv, b_qkv.reshape(1, H3))


def attn_out_residual_ln(ctx, resid, w, b, g, beta, eps=_LN_EPS):
    M, H = ctx.shape
    tm = _row_tile(M)
    ctxp = _pad_rows(ctx, tm)
    residp = _pad_rows(resid, tm)
    Mp = ctxp.shape[0]
    out = pl.pallas_call(
        functools.partial(_attn_out_ln_kernel, eps=eps),
        out_shape=jax.ShapeDtypeStruct((Mp, H), _STATE_DTYPE),
        grid=(Mp // tm,),
        in_specs=[_row_spec(tm, H), _row_spec(tm, H), _rep_spec((H, H)),
                  _rep_spec((1, H)), _rep_spec((1, H)), _rep_spec((1, H))],
        out_specs=_row_spec(tm, H),
        compiler_params=_cparams(1),
    )(ctxp, residp, w, b.reshape(1, H), g.reshape(1, H), beta.reshape(1, H))
    return out[:M] if Mp != M else out


def ffn_residual_ln(x, wi, bi, wo, bo, g, beta, eps=_LN_EPS):
    M, H = x.shape
    I = wi.shape[1]
    tm = _row_tile(M)
    xp = _pad_rows(x, tm)
    Mp = xp.shape[0]
    chunk = _ffn_chunk(I)
    out = pl.pallas_call(
        functools.partial(_ffn_ln_kernel, eps=eps, chunk=chunk),
        out_shape=jax.ShapeDtypeStruct((Mp, H), _STATE_DTYPE),
        grid=(Mp // tm,),
        in_specs=[_row_spec(tm, H), _rep_spec((H, I)), _rep_spec((1, I)),
                  _rep_spec((I, H)), _rep_spec((1, H)), _rep_spec((1, H)),
                  _rep_spec((1, H))],
        out_specs=_row_spec(tm, H),
        scratch_shapes=[pltpu.VMEM((tm, H), jnp.float32)],
        compiler_params=_cparams(1),
    )(xp, wi, bi.reshape(1, I), wo, bo.reshape(1, H),
      g.reshape(1, H), beta.reshape(1, H))
    return out[:M] if Mp != M else out


def pooler_heads(cls_tok, wp, bp, wh, bh):
    B, H = cls_tok.shape
    NOUT = wh.shape[1]
    vmem = pl.BlockSpec(memory_space=pltpu.MemorySpace.VMEM)
    return pl.pallas_call(
        _pooler_heads_kernel,
        out_shape=jax.ShapeDtypeStruct((B, NOUT), jnp.float32),
        in_specs=[vmem] * 5,
        out_specs=vmem,
    )(cls_tok, wp, bp.reshape(1, H), wh, bh.reshape(1, NOUT))


# ----------------------------------------------------------------------------- #
# Model (synthetic small BERT + multi-task heads)
# ----------------------------------------------------------------------------- #
def init_params(key, *, vocab=100, max_pos=16, hidden=32, num_heads=4,
                num_layers=2, intermediate=64):
    del num_heads  # static Python arg to the forward fn, NOT in the pytree

    def nrm(k, shape):
        return 0.02 * jax.random.normal(k, shape, dtype=jnp.float32)

    def w(k, shape):  # matmul weights live in bf16 (cast once, not per grid step)
        return nrm(k, shape).astype(_MXU_DTYPE)

    keys = jax.random.split(key, 4 + num_layers)
    params = {
        "word_emb": nrm(keys[0], (vocab, hidden)),
        "pos_emb": nrm(keys[1], (max_pos, hidden)),
        "type_emb": nrm(keys[2], (2, hidden)),
        "emb_ln_g": jnp.ones((hidden,), jnp.float32),
        "emb_ln_b": jnp.zeros((hidden,), jnp.float32),
        "layers": [],
    }
    for li in range(num_layers):
        lk = jax.random.split(keys[3 + li], 6)
        wq, wk, wv = (nrm(lk[0], (hidden, hidden)), nrm(lk[1], (hidden, hidden)),
                      nrm(lk[2], (hidden, hidden)))
        params["layers"].append({
            "w_qkv": jnp.concatenate([wq, wk, wv], axis=1).astype(_MXU_DTYPE),
            "b_qkv": jnp.zeros((3 * hidden,), jnp.float32),
            "wo": w(lk[3], (hidden, hidden)), "bo": jnp.zeros((hidden,), jnp.float32),
            "ln1_g": jnp.ones((hidden,), jnp.float32),
            "ln1_b": jnp.zeros((hidden,), jnp.float32),
            "wi": w(lk[4], (hidden, intermediate)),
            "bi": jnp.zeros((intermediate,), jnp.float32),
            "wo2": w(lk[5], (intermediate, hidden)),
            "bo2": jnp.zeros((hidden,), jnp.float32),
            "ln2_g": jnp.ones((hidden,), jnp.float32),
            "ln2_b": jnp.zeros((hidden,), jnp.float32),
        })
    hk = jax.random.split(keys[3 + num_layers - 1], 3)
    params["pooler_w"] = w(hk[0], (hidden, hidden))
    params["pooler_b"] = jnp.zeros((hidden,), jnp.float32)
    # two heads (fc_polarity, fc_usefulness), each hidden -> 1, stacked to hidden -> 2
    params["heads_w"] = jnp.concatenate(
        [nrm(hk[1], (hidden, 1)), nrm(hk[2], (hidden, 1))], axis=1).astype(_MXU_DTYPE)
    params["heads_b"] = jnp.zeros((2,), jnp.float32)
    return params


def multi_task_bert_forward(params, input_ids, attention_mask, *, num_heads):
    """Returns (polarity_output, usefulness_output), each (B, 1) float32."""
    B, S = input_ids.shape
    H = params["word_emb"].shape[1]
    scale = 1.0 / ((H // num_heads) ** 0.5)

    # ---- embeddings (gathers are XLA glue; LayerNorm runs in Pallas) ----
    # TODO(synk): token_type_ids hard-coded to type 0 for all tokens.
    x = (jnp.take(params["word_emb"], input_ids, axis=0)
         + params["pos_emb"][None, :S, :]
         + params["type_emb"][0][None, None, :])
    x = layernorm(x.reshape(B * S, H), params["emb_ln_g"], params["emb_ln_b"])  # bf16

    # additive attention-mask bias, kept at (B, 1, S) (no per-head broadcast in HBM)
    mask_bias = ((1.0 - attention_mask.astype(jnp.float32)) * -10000.0).reshape(B, 1, S)

    for lyr in params["layers"]:
        ctx = fused_qkv_attention(x.reshape(B, S, H), mask_bias,
                                  lyr["w_qkv"], lyr["b_qkv"], num_heads, scale)
        x = attn_out_residual_ln(ctx.reshape(B * S, H), x, lyr["wo"], lyr["bo"],
                                 lyr["ln1_g"], lyr["ln1_b"])
        x = ffn_residual_ln(x, lyr["wi"], lyr["bi"], lyr["wo2"], lyr["bo2"],
                            lyr["ln2_g"], lyr["ln2_b"])

    cls_tok = x.reshape(B, S, H)[:, 0, :]            # pooler reads the [CLS] token
    heads = pooler_heads(cls_tok, params["pooler_w"], params["pooler_b"],
                         params["heads_w"], params["heads_b"])
    return heads[:, 0:1], heads[:, 1:2]


# ----------------------------------------------------------------------------- #
# Main
# ----------------------------------------------------------------------------- #
if __name__ == "__main__":
    _probe_single_buffering()   # decide Buffered(1) support before any tracing

    key = jax.random.PRNGKey(0)
    pkey, ikey = jax.random.split(key)

    B, S, VOCAB, HIDDEN, NH = 2, 8, 100, 32, 4
    params = init_params(pkey, vocab=VOCAB, max_pos=16, hidden=HIDDEN,
                         num_heads=NH, num_layers=2, intermediate=64)

    input_ids = jax.random.randint(ikey, (B, S), 0, VOCAB, dtype=jnp.int32)
    attention_mask = jnp.ones((B, S), dtype=jnp.int32).at[1, 6:].set(0)

    fwd = jax.jit(multi_task_bert_forward, static_argnames=("num_heads",))
    polarity, usefulness = fwd(params, input_ids, attention_mask, num_heads=NH)
    jax.block_until_ready((polarity, usefulness))

    assert polarity.shape == (B, 1) and usefulness.shape == (B, 1)
    print("KERNEL_OK")
</pallas_src>

<mosaic_0001>
module attributes {stable_mosaic.version = 11 : i64} {
  func.func @k(%arg0: i32, %arg1: memref<1x128xf32, #tpu.memory_space<vmem>>, %arg2: memref<8x128xf32, #tpu.memory_space<vmem>>, %arg3: memref<8x128xf32, #tpu.memory_space<vmem>>) attributes {dimension_semantics = [#tpu.dimension_semantics<arbitrary>], iteration_bounds = array<i64: 2>, scalar_prefetch = 0 : i64, scratch_operands = 0 : i64, tpu.core_type = #tpu.core_type<tc>, window_params = [{pipeline_mode = #tpu.pipeline_mode<synchronous>, transform_indices = @transform_0, window_bounds = array<i64: 1, 128>}, {transform_indices = @transform_1, window_bounds = array<i64: 8, 128>}, {transform_indices = @transform_2, window_bounds = array<i64: 8, 128>}]} {
    %c0 = arith.constant 0 : index
    %c0_0 = arith.constant 0 : index
    %0 = vector.load %arg2[%c0, %c0_0] : memref<8x128xf32, #tpu.memory_space<vmem>>, vector<8x128xf32>
    %c0_1 = arith.constant 0 : index
    %c0_2 = arith.constant 0 : index
    %1 = vector.load %arg1[%c0_1, %c0_2] : memref<1x128xf32, #tpu.memory_space<vmem>>, vector<1x128xf32>
    %2 = vector.broadcast %1 : vector<1x128xf32> to vector<8x128xf32>
    %3 = arith.addf %0, %2 : vector<8x128xf32>
    %c0_3 = arith.constant 0 : index
    %c0_4 = arith.constant 0 : index
    %4 = vector.load %arg3[%c0_3, %c0_4] : memref<8x128xf32, #tpu.memory_space<vmem>>, vector<8x128xf32>
    tpu.vector_store %arg3[%c0_3, %c0_4], %3 {strides = array<i32>} : memref<8x128xf32, #tpu.memory_space<vmem>>, vector<8x128xf32>,
    return
  }
  func.func @transform_0(%arg0: i32) -> (i32, i32) {
    %c0_i32 = arith.constant 0 : i32
    %c0_i32_0 = arith.constant 0 : i32
    %c0_i32_1 = arith.constant 0 : i32
    return %c0_i32, %c0_i32_0 : i32, i32
  }
  func.func @transform_1(%arg0: i32) -> (i32, i32) {
    %c0_i32 = arith.constant 0 : i32
    %c0_i32_0 = arith.constant 0 : i32
    return %arg0, %c0_i32 : i32, i32
  }
  func.func @transform_2(%arg0: i32) -> (i32, i32) {
    %c0_i32 = arith.constant 0 : i32
    %c0_i32_0 = arith.constant 0 : i32
    return %arg0, %c0_i32 : i32, i32
  }
}

module attributes {stable_mosaic.version = 11 : i64} {
  func.func @_fused_attn_kernel(%arg0: i32, %arg1: memref<1x8x32xbf16, #tpu.memory_space<vmem>>, %arg2: memref<1x1x8xf32, #tpu.memory_space<vmem>>, %arg3: memref<32x96xbf16, #tpu.memory_space<vmem>>, %arg4: memref<1x96xf32, #tpu.memory_space<vmem>>, %arg5: memref<1x8x32xbf16, #tpu.memory_space<vmem>>) attributes {dimension_semantics = [#tpu.dimension_semantics<parallel>], iteration_bounds = array<i64: 2>, scalar_prefetch = 0 : i64, scratch_operands = 0 : i64, tpu.core_type = #tpu.core_type<tc>, window_params = [{transform_indices = @transform_0, window_bounds = array<i64: 1, 8, 32>}, {transform_indices = @transform_1, window_bounds = array<i64: 1, 1, 8>}, {pipeline_mode = #tpu.pipeline_mode<synchronous>, transform_indices = @transform_2, window_bounds = array<i64: 32, 96>}, {pipeline_mode = #tpu.pipeline_mode<synchronous>, transform_indices = @transform_3, window_bounds = array<i64: 1, 96>}, {transform_indices = @transform_4, window_bounds = array<i64: 1, 8, 32>}]} {
    %c0 = arith.constant 0 : index
    %c0_0 = arith.constant 0 : index
    %c0_1 = arith.constant 0 : index
    %0 = vector.load %arg1[%c0, %c0_0, %c0_1] : memref<1x8x32xbf16, #tpu.memory_space<vmem>>, vector<1x8x32xbf16>
    %1 = vector.shape_cast %0 : vector<1x8x32xbf16> to vector<8x32xbf16>
    %c0_2 = arith.constant 0 : index
    %c0_3 = arith.constant 0 : index
    %2 = vector.load %arg3[%c0_2, %c0_3] : memref<32x96xbf16, #tpu.memory_space<vmem>>, vector<32x96xbf16>
    %cst = arith.constant dense<0.000000e+00> : vector<8x96xf32>
    %3 = tpu.matmul %1, %2, %cst {dimension_numbers = #tpu.dot_dimension_numbers<[1], [0], [0], [1], [0, 0, 1, 1], [], []>} : vector<8x32xbf16>, vector<32x96xbf16>, vector<8x96xf32> -> vector<8x96xf32>
    %c0_4 = arith.constant 0 : index
    %c0_5 = arith.constant 0 : index
    %4 = vector.load %arg4[%c0_4, %c0_5] : memref<1x96xf32, #tpu.memory_space<vmem>>, vector<1x96xf32>
    %5 = vector.broadcast %4 : vector<1x96xf32> to vector<8x96xf32>
    %6 = arith.addf %3, %5 : vector<8x96xf32>
    %7 = vector.extract_strided_slice %6 {offsets = [0, 0], sizes = [8, 32], strides = [1, 1]} : vector<8x96xf32> to vector<8x32xf32>
    %cst_6 = arith.constant 0.353553385 : f32
    %8 = vector.broadcast %cst_6 : f32 to vector<8x32xf32>
    %9 = arith.mulf %7, %8 : vector<8x32xf32>
    %10 = vector.shape_cast %9 : vector<8x32xf32> to vector<8x4x8xf32>
    %11 = arith.truncf %10 : vector<8x4x8xf32> to vector<8x4x8xbf16>
    %12 = vector.extract_strided_slice %6 {offsets = [0, 32], sizes = [8, 32], strides = [1, 1]} : vector<8x96xf32> to vector<8x32xf32>
    %13 = vector.shape_cast %12 : vector<8x32xf32> to vector<8x4x8xf32>
    %14 = arith.truncf %13 : vector<8x4x8xf32> to vector<8x4x8xbf16>
    %15 = vector.extract_strided_slice %6 {offsets = [0, 64], sizes = [8, 32], strides = [1, 1]} : vector<8x96xf32> to vector<8x32xf32>
    %16 = vector.shape_cast %15 : vector<8x32xf32> to vector<8x4x8xf32>
    %17 = arith.truncf %16 : vector<8x4x8xf32> to vector<8x4x8xbf16>
    "tpu.trace_start"() <{level = 10 : i32, message = "qhd,khd->hqk"}> : () -> ()
    %cst_7 = arith.constant dense<0.000000e+00> : vector<4x8x8xf32>
    %18 = tpu.matmul %11, %14, %cst_7 {dimension_numbers = #tpu.dot_dimension_numbers<[2], [2], [0], [0], [0, 1, 0, 0, 1, 0], [1], [1]>} : vector<8x4x8xbf16>, vector<8x4x8xbf16>, vector<4x8x8xf32> -> vector<4x8x8xf32>
    "tpu.trace_stop"() : () -> ()
    %c0_8 = arith.constant 0 : index
    %c0_9 = arith.constant 0 : index
    %c0_10 = arith.constant 0 : index
    %19 = vector.load %arg2[%c0_8, %c0_9, %c0_10] : memref<1x1x8xf32, #tpu.memory_space<vmem>>, vector<1x1x8xf32>
    %20 = vector.shape_cast %19 : vector<1x1x8xf32> to vector<1x8xf32>
    %21 = vector.shape_cast %20 : vector<1x8xf32> to vector<1x1x8xf32>
    %22 = vector.broadcast %21 : vector<1x1x8xf32> to vector<4x8x8xf32>
    %23 = arith.addf %18, %22 : vector<4x8x8xf32>
    %cst_11 = arith.constant dense<0xFF800000> : vector<4x8xf32>
    %24 = vector.multi_reduction <maximumf>, %23, %cst_11 [2] : vector<4x8x8xf32> to vector<4x8xf32>
    %25 = vector.shape_cast %24 : vector<4x8xf32> to vector<4x8x1xf32>
    %26 = vector.broadcast %25 : vector<4x8x1xf32> to vector<4x8x8xf32>
    %27 = arith.subf %23, %26 : vector<4x8x8xf32>
    %28 = math.exp %27 : vector<4x8x8xf32>
    %cst_12 = arith.constant dense<0.000000e+00> : vector<4x8xf32>
    %29 = vector.multi_reduction <add>, %28, %cst_12 [2] : vector<4x8x8xf32> to vector<4x8xf32>
    %30 = vector.shape_cast %29 : vector<4x8xf32> to vector<4x8x1xf32>
    %31 = tpu.reciprocal %30 {approx = true} : vector<4x8x1xf32> -> vector<4x8x1xf32>
    %32 = vector.broadcast %31 : vector<4x8x1xf32> to vector<4x8x8xf32>
    %33 = arith.mulf %28, %32 : vector<4x8x8xf32>
    %34 = arith.truncf %33 : vector<4x8x8xf32> to vector<4x8x8xbf16>
    "tpu.trace_start"() <{level = 10 : i32, message = "hqk,khd->qhd"}> : () -> ()
    %cst_13 = arith.constant dense<0.000000e+00> : vector<4x8x8xf32>
    %35 = tpu.matmul %17, %34, %cst_13 {dimension_numbers = #tpu.dot_dimension_numbers<[0], [2], [2], [1], [0, 1, 0, 2, 1, 1], [1], [0]>} : vector<8x4x8xbf16>, vector<4x8x8xbf16>, vector<4x8x8xf32> -> vector<4x8x8xf32>
    %36 = tpu.transpose %35, [2, 0, 1] : vector<4x8x8xf32> -> vector<8x4x8xf32>
    "tpu.trace_stop"() : () -> ()
    %37 = vector.shape_cast %36 : vector<8x4x8xf32> to vector<8x32xf32>
    %38 = arith.truncf %37 : vector<8x32xf32> to vector<8x32xbf16>
    %c0_14 = arith.constant 0 : index
    %c0_15 = arith.constant 0 : index
    %c0_16 = arith.constant 0 : index
    %39 = vector.load %arg5[%c0_14, %c0_15, %c0_16] : memref<1x8x32xbf16, #tpu.memory_space<vmem>>, vector<1x8x32xbf16>
    %40 = vector.shape_cast %39 : vector<1x8x32xbf16> to vector<8x32xbf16>
    %41 = vector.shape_cast %38 : vector<8x32xbf16> to vector<1x8x32xbf16>
    tpu.vector_store %arg5[%c0_14, %c0_15, %c0_16], %41 {strides = array<i32>} : memref<1x8x32xbf16, #tpu.memory_space<vmem>>, vector<1x8x32xbf16>,
    return
  }
  func.func @transform_0(%arg0: i32) -> (i32, i32, i32) {
    %c0_i32 = arith.constant 0 : i32
    %c0_i32_0 = arith.constant 0 : i32
    %c0_i32_1 = arith.constant 0 : i32
    return %arg0, %c0_i32, %c0_i32_0 : i32, i32, i32
  }
  func.func @transform_1(%arg0: i32) -> (i32, i32, i32) {
    %c0_i32 = arith.constant 0 : i32
    %c0_i32_0 = arith.constant 0 : i32
    %c0_i32_1 = arith.constant 0 : i32
    return %arg0, %c0_i32, %c0_i32_0 : i32, i32, i32
  }
  func.func @transform_2(%arg0: i32) -> (i32, i32) {
    %c0_i32 = arith.constant 0 : i32
    %c0_i32_0 = arith.constant 0 : i32
    %c0_i32_1 = arith.constant 0 : i32
    return %c0_i32, %c0_i32_0 : i32, i32
  }
  func.func @transform_3(%arg0: i32) -> (i32, i32) {
    %c0_i32 = arith.constant 0 : i32
    %c0_i32_0 = arith.constant 0 : i32
    %c0_i32_1 = arith.constant 0 : i32
    return %c0_i32, %c0_i32_0 : i32, i32
  }
  func.func @transform_4(%arg0: i32) -> (i32, i32, i32) {
    %c0_i32 = arith.constant 0 : i32
    %c0_i32_0 = arith.constant 0 : i32
    %c0_i32_1 = arith.constant 0 : i32
    return %arg0, %c0_i32, %c0_i32_0 : i32, i32, i32
  }
}

module attributes {stable_mosaic.version = 11 : i64} {
  func.func @_ln_kernel(%arg0: i32, %arg1: memref<16x32xf32, #tpu.memory_space<vmem>>, %arg2: memref<1x32xf32, #tpu.memory_space<vmem>>, %arg3: memref<1x32xf32, #tpu.memory_space<vmem>>, %arg4: memref<16x32xbf16, #tpu.memory_space<vmem>>) attributes {dimension_semantics = [#tpu.dimension_semantics<parallel>], iteration_bounds = array<i64: 1>, scalar_prefetch = 0 : i64, scratch_operands = 0 : i64, tpu.core_type = #tpu.core_type<tc>, window_params = [{transform_indices = @transform_0, window_bounds = array<i64: 16, 32>}, {pipeline_mode = #tpu.pipeline_mode<synchronous>, transform_indices = @transform_1, window_bounds = array<i64: 1, 32>}, {pipeline_mode = #tpu.pipeline_mode<synchronous>, transform_indices = @transform_2, window_bounds = array<i64: 1, 32>}, {transform_indices = @transform_3, window_bounds = array<i64: 16, 32>}]} {
    %c0 = arith.constant 0 : index
    %c0_0 = arith.constant 0 : index
    %0 = vector.load %arg1[%c0, %c0_0] : memref<16x32xf32, #tpu.memory_space<vmem>>, vector<16x32xf32>
    %c0_1 = arith.constant 0 : index
    %c0_2 = arith.constant 0 : index
    %1 = vector.load %arg2[%c0_1, %c0_2] : memref<1x32xf32, #tpu.memory_space<vmem>>, vector<1x32xf32>
    %c0_3 = arith.constant 0 : index
    %c0_4 = arith.constant 0 : index
    %2 = vector.load %arg3[%c0_3, %c0_4] : memref<1x32xf32, #tpu.memory_space<vmem>>, vector<1x32xf32>
    %cst = arith.constant dense<0.000000e+00> : vector<16xf32>
    %3 = vector.multi_reduction <add>, %0, %cst [1] : vector<16x32xf32> to vector<16xf32>
    %4 = vector.shape_cast %3 : vector<16xf32> to vector<16x1xf32>
    %cst_5 = arith.constant 3.200000e+01 : f32
    %5 = vector.broadcast %cst_5 : f32 to vector<16x1xf32>
    %6 = arith.divf %4, %5 : vector<16x1xf32>
    %7 = vector.broadcast %6 : vector<16x1xf32> to vector<16x32xf32>
    %8 = arith.subf %0, %7 : vector<16x32xf32>
    %9 = arith.mulf %8, %8 : vector<16x32xf32>
    %cst_6 = arith.constant dense<0.000000e+00> : vector<16xf32>
    %10 = vector.multi_reduction <add>, %9, %cst_6 [1] : vector<16x32xf32> to vector<16xf32>
    %11 = vector.shape_cast %10 : vector<16xf32> to vector<16x1xf32>
    %cst_7 = arith.constant 3.200000e+01 : f32
    %12 = vector.broadcast %cst_7 : f32 to vector<16x1xf32>
    %13 = arith.divf %11, %12 : vector<16x1xf32>
    %14 = vector.broadcast %6 : vector<16x1xf32> to vector<16x32xf32>
    %15 = arith.subf %0, %14 : vector<16x32xf32>
    %cst_8 = arith.constant 9.99999996E-13 : f32
    %16 = vector.broadcast %cst_8 : f32 to vector<16x1xf32>
    %17 = arith.addf %13, %16 : vector<16x1xf32>
    %18 = math.rsqrt %17 : vector<16x1xf32>
    %19 = vector.broadcast %18 : vector<16x1xf32> to vector<16x32xf32>
    %20 = arith.mulf %15, %19 : vector<16x32xf32>
    %21 = vector.broadcast %1 : vector<1x32xf32> to vector<16x32xf32>
    %22 = arith.mulf %20, %21 : vector<16x32xf32>
    %23 = vector.broadcast %2 : vector<1x32xf32> to vector<16x32xf32>
    %24 = arith.addf %22, %23 : vector<16x32xf32>
    %25 = arith.truncf %24 : vector<16x32xf32> to vector<16x32xbf16>
    %c0_9 = arith.constant 0 : index
    %c0_10 = arith.constant 0 : index
    %26 = vector.load %arg4[%c0_9, %c0_10] : memref<16x32xbf16, #tpu.memory_space<vmem>>, vector<16x32xbf16>
    tpu.vector_store %arg4[%c0_9, %c0_10], %25 {strides = array<i32>} : memref<16x32xbf16, #tpu.memory_space<vmem>>, vector<16x32xbf16>,
    return
  }
  func.func @transform_0(%arg0: i32) -> (i32, i32) {
    %c0_i32 = arith.constant 0 : i32
    %c0_i32_0 = arith.constant 0 : i32
    return %arg0, %c0_i32 : i32, i32
  }
  func.func @transform_1(%arg0: i32) -> (i32, i32) {
    %c0_i32 = arith.constant 0 : i32
    %c0_i32_0 = arith.constant 0 : i32
    %c0_i32_1 = arith.constant 0 : i32
    return %c0_i32, %c0_i32_0 : i32, i32
  }
  func.func @transform_2(%arg0: i32) -> (i32, i32) {
    %c0_i32 = arith.constant 0 : i32
    %c0_i32_0 = arith.constant 0 : i32
    %c0_i32_1 = arith.constant 0 : i32
    return %c0_i32, %c0_i32_0 : i32, i32
  }
  func.func @transform_3(%arg0: i32) -> (i32, i32) {
    %c0_i32 = arith.constant 0 : i32
    %c0_i32_0 = arith.constant 0 : i32
    return %arg0, %c0_i32 : i32, i32
  }
}

module attributes {stable_mosaic.version = 11 : i64} {
  func.func @_attn_out_ln_kernel(%arg0: i32, %arg1: memref<16x32xbf16, #tpu.memory_space<vmem>>, %arg2: memref<16x32xbf16, #tpu.memory_space<vmem>>, %arg3: memref<32x32xbf16, #tpu.memory_space<vmem>>, %arg4: memref<1x32xf32, #tpu.memory_space<vmem>>, %arg5: memref<1x32xf32, #tpu.memory_space<vmem>>, %arg6: memref<1x32xf32, #tpu.memory_space<vmem>>, %arg7: memref<16x32xbf16, #tpu.memory_space<vmem>>) attributes {dimension_semantics = [#tpu.dimension_semantics<parallel>], iteration_bounds = array<i64: 1>, scalar_prefetch = 0 : i64, scratch_operands = 0 : i64, tpu.core_type = #tpu.core_type<tc>, window_params = [{transform_indices = @transform_0, window_bounds = array<i64: 16, 32>}, {transform_indices = @transform_1, window_bounds = array<i64: 16, 32>}, {pipeline_mode = #tpu.pipeline_mode<synchronous>, transform_indices = @transform_2, window_bounds = array<i64: 32, 32>}, {pipeline_mode = #tpu.pipeline_mode<synchronous>, transform_indices = @transform_3, window_bounds = array<i64: 1, 32>}, {pipeline_mode = #tpu.pipeline_mode<synchronous>, transform_indices = @transform_4, window_bounds = array<i64: 1, 32>}, {pipeline_mode = #tpu.pipeline_mode<synchronous>, transform_indices = @transform_5, window_bounds = array<i64: 1, 32>}, {transform_indices = @transform_6, window_bounds = array<i64: 16, 32>}]} {
    %c0 = arith.constant 0 : index
    %c0_0 = arith.constant 0 : index
    %0 = vector.load %arg1[%c0, %c0_0] : memref<16x32xbf16, #tpu.memory_space<vmem>>, vector<16x32xbf16>
    %c0_1 = arith.constant 0 : index
    %c0_2 = arith.constant 0 : index
    %1 = vector.load %arg3[%c0_1, %c0_2] : memref<32x32xbf16, #tpu.memory_space<vmem>>, vector<32x32xbf16>
    %cst = arith.constant dense<0.000000e+00> : vector<16x32xf32>
    %2 = tpu.matmul %0, %1, %cst {dimension_numbers = #tpu.dot_dimension_numbers<[1], [0], [0], [1], [0, 0, 1, 1], [], []>} : vector<16x32xbf16>, vector<32x32xbf16>, vector<16x32xf32> -> vector<16x32xf32>
    %c0_3 = arith.constant 0 : index
    %c0_4 = arith.constant 0 : index
    %3 = vector.load %arg4[%c0_3, %c0_4] : memref<1x32xf32, #tpu.memory_space<vmem>>, vector<1x32xf32>
    %4 = vector.broadcast %3 : vector<1x32xf32> to vector<16x32xf32>
    %5 = arith.addf %2, %4 : vector<16x32xf32>
    %c0_5 = arith.constant 0 : index
    %c0_6 = arith.constant 0 : index
    %6 = vector.load %arg2[%c0_5, %c0_6] : memref<16x32xbf16, #tpu.memory_space<vmem>>, vector<16x32xbf16>
    %7 = arith.extf %6 : vector<16x32xbf16> to vector<16x32xf32>
    %8 = arith.addf %5, %7 : vector<16x32xf32>
    %c0_7 = arith.constant 0 : index
    %c0_8 = arith.constant 0 : index
    %9 = vector.load %arg5[%c0_7, %c0_8] : memref<1x32xf32, #tpu.memory_space<vmem>>, vector<1x32xf32>
    %c0_9 = arith.constant 0 : index
    %c0_10 = arith.constant 0 : index
    %10 = vector.load %arg6[%c0_9, %c0_10] : memref<1x32xf32, #tpu.memory_space<vmem>>, vector<1x32xf32>
    %cst_11 = arith.constant dense<0.000000e+00> : vector<16xf32>
    %11 = vector.multi_reduction <add>, %8, %cst_11 [1] : vector<16x32xf32> to vector<16xf32>
    %12 = vector.shape_cast %11 : vector<16xf32> to vector<16x1xf32>
    %cst_12 = arith.constant 3.200000e+01 : f32
    %13 = vector.broadcast %cst_12 : f32 to vector<16x1xf32>
    %14 = arith.divf %12, %13 : vector<16x1xf32>
    %15 = vector.broadcast %14 : vector<16x1xf32> to vector<16x32xf32>
    %16 = arith.subf %8, %15 : vector<16x32xf32>
    %17 = arith.mulf %16, %16 : vector<16x32xf32>
    %cst_13 = arith.constant dense<0.000000e+00> : vector<16xf32>
    %18 = vector.multi_reduction <add>, %17, %cst_13 [1] : vector<16x32xf32> to vector<16xf32>
    %19 = vector.shape_cast %18 : vector<16xf32> to vector<16x1xf32>
    %cst_14 = arith.constant 3.200000e+01 : f32
    %20 = vector.broadcast %cst_14 : f32 to vector<16x1xf32>
    %21 = arith.divf %19, %20 : vector<16x1xf32>
    %22 = vector.broadcast %14 : vector<16x1xf32> to vector<16x32xf32>
    %23 = arith.subf %8, %22 : vector<16x32xf32>
    %cst_15 = arith.constant 9.99999996E-13 : f32
    %24 = vector.broadcast %cst_15 : f32 to vector<16x1xf32>
    %25 = arith.addf %21, %24 : vector<16x1xf32>
    %26 = math.rsqrt %25 : vector<16x1xf32>
    %27 = vector.broadcast %26 : vector<16x1xf32> to vector<16x32xf32>
    %28 = arith.mulf %23, %27 : vector<16x32xf32>
    %29 = vector.broadcast %9 : vector<1x32xf32> to vector<16x32xf32>
    %30 = arith.mulf %28, %29 : vector<16x32xf32>
    %31 = vector.broadcast %10 : vector<1x32xf32> to vector<16x32xf32>
    %32 = arith.addf %30, %31 : vector<16x32xf32>
    %33 = arith.truncf %32 : vector<16x32xf32> to vector<16x32xbf16>
    %c0_16 = arith.constant 0 : index
    %c0_17 = arith.constant 0 : index
    %34 = vector.load %arg7[%c0_16, %c0_17] : memref<16x32xbf16, #tpu.memory_space<vmem>>, vector<16x32xbf16>
    tpu.vector_store %arg7[%c0_16, %c0_17], %33 {strides = array<i32>} : memref<16x32xbf16, #tpu.memory_space<vmem>>, vector<16x32xbf16>,
    return
  }
  func.func @transform_0(%arg0: i32) -> (i32, i32) {
    %c0_i32 = arith.constant 0 : i32
    %c0_i32_0 = arith.constant 0 : i32
    return %arg0, %c0_i32 : i32, i32
  }
  func.func @transform_1(%arg0: i32) -> (i32, i32) {
    %c0_i32 = arith.constant 0 : i32
    %c0_i32_0 = arith.constant 0 : i32
    return %arg0, %c0_i32 : i32, i32
  }
  func.func @transform_2(%arg0: i32) -> (i32, i32) {
    %c0_i32 = arith.constant 0 : i32
    %c0_i32_0 = arith.constant 0 : i32
    %c0_i32_1 = arith.constant 0 : i32
    return %c0_i32, %c0_i32_0 : i32, i32
  }
  func.func @transform_3(%arg0: i32) -> (i32, i32) {
    %c0_i32 = arith.constant 0 : i32
    %c0_i32_0 = arith.constant 0 : i32
    %c0_i32_1 = arith.constant 0 : i32
    return %c0_i32, %c0_i32_0 : i32, i32
  }
  func.func @transform_4(%arg0: i32) -> (i32, i32) {
    %c0_i32 = arith.constant 0 : i32
    %c0_i32_0 = arith.constant 0 : i32
    %c0_i32_1 = arith.constant 0 : i32
    return %c0_i32, %c0_i32_0 : i32, i32
  }
  func.func @transform_5(%arg0: i32) -> (i32, i32) {
    %c0_i32 = arith.constant 0 : i32
    %c0_i32_0 = arith.constant 0 : i32
    %c0_i32_1 = arith.constant 0 : i32
    return %c0_i32, %c0_i32_0 : i32, i32
  }
  func.func @transform_6(%arg0: i32) -> (i32, i32) {
    %c0_i32 = arith.constant 0 : i32
    %c0_i32_0 = arith.constant 0 : i32
    return %arg0, %c0_i32 : i32, i32
  }
}

module attributes {stable_mosaic.version = 11 : i64} {
  func.func @_ffn_ln_kernel(%arg0: i32, %arg1: memref<16x32xbf16, #tpu.memory_space<vmem>>, %arg2: memref<32x64xbf16, #tpu.memory_space<vmem>>, %arg3: memref<1x64xf32, #tpu.memory_space<vmem>>, %arg4: memref<64x32xbf16, #tpu.memory_space<vmem>>, %arg5: memref<1x32xf32, #tpu.memory_space<vmem>>, %arg6: memref<1x32xf32, #tpu.memory_space<vmem>>, %arg7: memref<1x32xf32, #tpu.memory_space<vmem>>, %arg8: memref<16x32xbf16, #tpu.memory_space<vmem>>, %arg9: memref<16x32xf32, #tpu.memory_space<vmem>>) attributes {dimension_semantics = [#tpu.dimension_semantics<parallel>], iteration_bounds = array<i64: 1>, scalar_prefetch = 0 : i64, scratch_operands = 1 : i64, tpu.core_type = #tpu.core_type<tc>, window_params = [{transform_indices = @transform_0, window_bounds = array<i64: 16, 32>}, {pipeline_mode = #tpu.pipeline_mode<synchronous>, transform_indices = @transform_1, window_bounds = array<i64: 32, 64>}, {pipeline_mode = #tpu.pipeline_mode<synchronous>, transform_indices = @transform_2, window_bounds = array<i64: 1, 64>}, {pipeline_mode = #tpu.pipeline_mode<synchronous>, transform_indices = @transform_3, window_bounds = array<i64: 64, 32>}, {pipeline_mode = #tpu.pipeline_mode<synchronous>, transform_indices = @transform_4, window_bounds = array<i64: 1, 32>}, {pipeline_mode = #tpu.pipeline_mode<synchronous>, transform_indices = @transform_5, window_bounds = array<i64: 1, 32>}, {pipeline_mode = #tpu.pipeline_mode<synchronous>, transform_indices = @transform_6, window_bounds = array<i64: 1, 32>}, {transform_indices = @transform_7, window_bounds = array<i64: 16, 32>}]} {
    %c0 = arith.constant 0 : index
    %c0_0 = arith.constant 0 : index
    %0 = vector.load %arg1[%c0, %c0_0] : memref<16x32xbf16, #tpu.memory_space<vmem>>, vector<16x32xbf16>
    %cst = arith.constant 0.000000e+00 : f32
    %1 = vector.broadcast %cst : f32 to vector<16x32xf32>
    %c0_1 = arith.constant 0 : index
    %c0_2 = arith.constant 0 : index
    %2 = vector.load %arg9[%c0_1, %c0_2] : memref<16x32xf32, #tpu.memory_space<vmem>>, vector<16x32xf32>
    tpu.vector_store %arg9[%c0_1, %c0_2], %1 {strides = array<i32>} : memref<16x32xf32, #tpu.memory_space<vmem>>, vector<16x32xf32>,
    %c0_3 = arith.constant 0 : index
    %c0_4 = arith.constant 0 : index
    %3 = vector.load %arg2[%c0_3, %c0_4] : memref<32x64xbf16, #tpu.memory_space<vmem>>, vector<32x64xbf16>
    %cst_5 = arith.constant dense<0.000000e+00> : vector<16x64xf32>
    %4 = tpu.matmul %0, %3, %cst_5 {dimension_numbers = #tpu.dot_dimension_numbers<[1], [0], [0], [1], [0, 0, 1, 1], [], []>} : vector<16x32xbf16>, vector<32x64xbf16>, vector<16x64xf32> -> vector<16x64xf32>
    %c0_6 = arith.constant 0 : index
    %c0_7 = arith.constant 0 : index
    %5 = vector.load %arg3[%c0_6, %c0_7] : memref<1x64xf32, #tpu.memory_space<vmem>>, vector<1x64xf32>
    %6 = vector.broadcast %5 : vector<1x64xf32> to vector<16x64xf32>
    %7 = arith.addf %4, %6 : vector<16x64xf32>
    %cst_8 = arith.constant 5.000000e-01 : f32
    %8 = vector.broadcast %cst_8 : f32 to vector<16x64xf32>
    %9 = arith.mulf %8, %7 : vector<16x64xf32>
    %cst_9 = arith.constant 4.471500e-02 : f32
    %10 = vector.broadcast %cst_9 : f32 to vector<16x64xf32>
    %11 = arith.mulf %10, %7 : vector<16x64xf32>
    %12 = arith.mulf %11, %7 : vector<16x64xf32>
    %13 = arith.mulf %12, %7 : vector<16x64xf32>
    %14 = arith.addf %7, %13 : vector<16x64xf32>
    %cst_10 = arith.constant 0.797884583 : f32
    %15 = vector.broadcast %cst_10 : f32 to vector<16x64xf32>
    %16 = arith.mulf %15, %14 : vector<16x64xf32>
    %17 = math.tanh %16 : vector<16x64xf32>
    %cst_11 = arith.constant 1.000000e+00 : f32
    %18 = vector.broadcast %cst_11 : f32 to vector<16x64xf32>
    %19 = arith.addf %18, %17 : vector<16x64xf32>
    %20 = arith.mulf %9, %19 : vector<16x64xf32>
    %c0_12 = arith.constant 0 : index
    %c0_13 = arith.constant 0 : index
    %21 = vector.load %arg9[%c0_12, %c0_13] : memref<16x32xf32, #tpu.memory_space<vmem>>, vector<16x32xf32>
    %22 = arith.truncf %20 : vector<16x64xf32> to vector<16x64xbf16>
    %c0_14 = arith.constant 0 : index
    %c0_15 = arith.constant 0 : index
    %23 = vector.load %arg4[%c0_14, %c0_15] : memref<64x32xbf16, #tpu.memory_space<vmem>>, vector<64x32xbf16>
    %cst_16 = arith.constant dense<0.000000e+00> : vector<16x32xf32>
    %24 = tpu.matmul %22, %23, %cst_16 {dimension_numbers = #tpu.dot_dimension_numbers<[1], [0], [0], [1], [0, 0, 1, 1], [], []>} : vector<16x64xbf16>, vector<64x32xbf16>, vector<16x32xf32> -> vector<16x32xf32>
    %25 = arith.addf %21, %24 : vector<16x32xf32>
    %c0_17 = arith.constant 0 : index
    %c0_18 = arith.constant 0 : index
    %26 = vector.load %arg9[%c0_17, %c0_18] : memref<16x32xf32, #tpu.memory_space<vmem>>, vector<16x32xf32>
    tpu.vector_store %arg9[%c0_17, %c0_18], %25 {strides = array<i32>} : memref<16x32xf32, #tpu.memory_space<vmem>>, vector<16x32xf32>,
    %c0_19 = arith.constant 0 : index
    %c0_20 = arith.constant 0 : index
    %27 = vector.load %arg9[%c0_19, %c0_20] : memref<16x32xf32, #tpu.memory_space<vmem>>, vector<16x32xf32>
    %c0_21 = arith.constant 0 : index
    %c0_22 = arith.constant 0 : index
    %28 = vector.load %arg5[%c0_21, %c0_22] : memref<1x32xf32, #tpu.memory_space<vmem>>, vector<1x32xf32>
    %29 = vector.broadcast %28 : vector<1x32xf32> to vector<16x32xf32>
    %30 = arith.addf %27, %29 : vector<16x32xf32>
    %31 = arith.extf %0 : vector<16x32xbf16> to vector<16x32xf32>
    %32 = arith.addf %30, %31 : vector<16x32xf32>
    %c0_23 = arith.constant 0 : index
    %c0_24 = arith.constant 0 : index
    %33 = vector.load %arg6[%c0_23, %c0_24] : memref<1x32xf32, #tpu.memory_space<vmem>>, vector<1x32xf32>
    %c0_25 = arith.constant 0 : index
    %c0_26 = arith.constant 0 : index
    %34 = vector.load %arg7[%c0_25, %c0_26] : memref<1x32xf32, #tpu.memory_space<vmem>>, vector<1x32xf32>
    %cst_27 = arith.constant dense<0.000000e+00> : vector<16xf32>
    %35 = vector.multi_reduction <add>, %32, %cst_27 [1] : vector<16x32xf32> to vector<16xf32>
    %36 = vector.shape_cast %35 : vector<16xf32> to vector<16x1xf32>
    %cst_28 = arith.constant 3.200000e+01 : f32
    %37 = vector.broadcast %cst_28 : f32 to vector<16x1xf32>
    %38 = arith.divf %36, %37 : vector<16x1xf32>
    %39 = vector.broadcast %38 : vector<16x1xf32> to vector<16x32xf32>
    %40 = arith.subf %32, %39 : vector<16x32xf32>
    %41 = arith.mulf %40, %40 : vector<16x32xf32>
    %cst_29 = arith.constant dense<0.000000e+00> : vector<16xf32>
    %42 = vector.multi_reduction <add>, %41, %cst_29 [1] : vector<16x32xf32> to vector<16xf32>
    %43 = vector.shape_cast %42 : vector<16xf32> to vector<16x1xf32>
    %cst_30 = arith.constant 3.200000e+01 : f32
    %44 = vector.broadcast %cst_30 : f32 to vector<16x1xf32>
    %45 = arith.divf %43, %44 : vector<16x1xf32>
    %46 = vector.broadcast %38 : vector<16x1xf32> to vector<16x32xf32>
    %47 = arith.subf %32, %46 : vector<16x32xf32>
    %cst_31 = arith.constant 9.99999996E-13 : f32
    %48 = vector.broadcast %cst_31 : f32 to vector<16x1xf32>
    %49 = arith.addf %45, %48 : vector<16x1xf32>
    %50 = math.rsqrt %49 : vector<16x1xf32>
    %51 = vector.broadcast %50 : vector<16x1xf32> to vector<16x32xf32>
    %52 = arith.mulf %47, %51 : vector<16x32xf32>
    %53 = vector.broadcast %33 : vector<1x32xf32> to vector<16x32xf32>
    %54 = arith.mulf %52, %53 : vector<16x32xf32>
    %55 = vector.broadcast %34 : vector<1x32xf32> to vector<16x32xf32>
    %56 = arith.addf %54, %55 : vector<16x32xf32>
    %57 = arith.truncf %56 : vector<16x32xf32> to vector<16x32xbf16>
    %c0_32 = arith.constant 0 : index
    %c0_33 = arith.constant 0 : index
    %58 = vector.load %arg8[%c0_32, %c0_33] : memref<16x32xbf16, #tpu.memory_space<vmem>>, vector<16x32xbf16>
    tpu.vector_store %arg8[%c0_32, %c0_33], %57 {strides = array<i32>} : memref<16x32xbf16, #tpu.memory_space<vmem>>, vector<16x32xbf16>,
    return
  }
  func.func @transform_0(%arg0: i32) -> (i32, i32) {
    %c0_i32 = arith.constant 0 : i32
    %c0_i32_0 = arith.constant 0 : i32
    return %arg0, %c0_i32 : i32, i32
  }
  func.func @transform_1(%arg0: i32) -> (i32, i32) {
    %c0_i32 = arith.constant 0 : i32
    %c0_i32_0 = arith.constant 0 : i32
    %c0_i32_1 = arith.constant 0 : i32
    return %c0_i32, %c0_i32_0 : i32, i32
  }
  func.func @transform_2(%arg0: i32) -> (i32, i32) {
    %c0_i32 = arith.constant 0 : i32
    %c0_i32_0 = arith.constant 0 : i32
    %c0_i32_1 = arith.constant 0 : i32
    return %c0_i32, %c0_i32_0 : i32, i32
  }
  func.func @transform_3(%arg0: i32) -> (i32, i32) {
    %c0_i32 = arith.constant 0 : i32
    %c0_i32_0 = arith.constant 0 : i32
    %c0_i32_1 = arith.constant 0 : i32
    return %c0_i32, %c0_i32_0 : i32, i32
  }
  func.func @transform_4(%arg0: i32) -> (i32, i32) {
    %c0_i32 = arith.constant 0 : i32
    %c0_i32_0 = arith.constant 0 : i32
    %c0_i32_1 = arith.constant 0 : i32
    return %c0_i32, %c0_i32_0 : i32, i32
  }
  func.func @transform_5(%arg0: i32) -> (i32, i32) {
    %c0_i32 = arith.constant 0 : i32
    %c0_i32_0 = arith.constant 0 : i32
    %c0_i32_1 = arith.constant 0 : i32
    return %c0_i32, %c0_i32_0 : i32, i32
  }
  func.func @transform_6(%arg0: i32) -> (i32, i32) {
    %c0_i32 = arith.constant 0 : i32
    %c0_i32_0 = arith.constant 0 : i32
    %c0_i32_1 = arith.constant 0 : i32
    return %c0_i32, %c0_i32_0 : i32, i32
  }
  func.func @transform_7(%arg0: i32) -> (i32, i32) {
    %c0_i32 = arith.constant 0 : i32
    %c0_i32_0 = arith.constant 0 : i32
    return %arg0, %c0_i32 : i32, i32
  }
}

module attributes {stable_mosaic.version = 11 : i64} {
  func.func @_pooler_heads_kernel(%arg0: memref<2x32xbf16, #tpu.memory_space<vmem>>, %arg1: memref<32x32xbf16, #tpu.memory_space<vmem>>, %arg2: memref<1x32xf32, #tpu.memory_space<vmem>>, %arg3: memref<32x2xbf16, #tpu.memory_space<vmem>>, %arg4: memref<1x2xf32, #tpu.memory_space<vmem>>, %arg5: memref<2x2xf32, #tpu.memory_space<vmem>>) attributes {dimension_semantics = [], scalar_prefetch = 0 : i64, scratch_operands = 0 : i64, tpu.core_type = #tpu.core_type<tc>} {
    %c0 = arith.constant 0 : index
    %c0_0 = arith.constant 0 : index
    %0 = vector.load %arg0[%c0, %c0_0] : memref<2x32xbf16, #tpu.memory_space<vmem>>, vector<2x32xbf16>
    %c0_1 = arith.constant 0 : index
    %c0_2 = arith.constant 0 : index
    %1 = vector.load %arg1[%c0_1, %c0_2] : memref<32x32xbf16, #tpu.memory_space<vmem>>, vector<32x32xbf16>
    %cst = arith.constant dense<0.000000e+00> : vector<2x32xf32>
    %2 = tpu.matmul %0, %1, %cst {dimension_numbers = #tpu.dot_dimension_numbers<[1], [0], [0], [1], [0, 0, 1, 1], [], []>} : vector<2x32xbf16>, vector<32x32xbf16>, vector<2x32xf32> -> vector<2x32xf32>
    %c0_3 = arith.constant 0 : index
    %c0_4 = arith.constant 0 : index
    %3 = vector.load %arg2[%c0_3, %c0_4] : memref<1x32xf32, #tpu.memory_space<vmem>>, vector<1x32xf32>
    %4 = vector.broadcast %3 : vector<1x32xf32> to vector<2x32xf32>
    %5 = arith.addf %2, %4 : vector<2x32xf32>
    %6 = math.tanh %5 : vector<2x32xf32>
    %7 = arith.truncf %6 : vector<2x32xf32> to vector<2x32xbf16>
    %c0_5 = arith.constant 0 : index
    %c0_6 = arith.constant 0 : index
    %8 = vector.load %arg3[%c0_5, %c0_6] : memref<32x2xbf16, #tpu.memory_space<vmem>>, vector<32x2xbf16>
    %cst_7 = arith.constant dense<0.000000e+00> : vector<2x2xf32>
    %9 = tpu.matmul %7, %8, %cst_7 {dimension_numbers = #tpu.dot_dimension_numbers<[1], [0], [0], [1], [0, 0, 1, 1], [], []>} : vector<2x32xbf16>, vector<32x2xbf16>, vector<2x2xf32> -> vector<2x2xf32>
    %c0_8 = arith.constant 0 : index
    %c0_9 = arith.constant 0 : index
    %10 = vector.load %arg4[%c0_8, %c0_9] : memref<1x2xf32, #tpu.memory_space<vmem>>, vector<1x2xf32>
    %11 = vector.broadcast %10 : vector<1x2xf32> to vector<2x2xf32>
    %12 = arith.addf %9, %11 : vector<2x2xf32>
    %c0_10 = arith.constant 0 : index
    %c0_11 = arith.constant 0 : index
    %13 = vector.load %arg5[%c0_10, %c0_11] : memref<2x2xf32, #tpu.memory_space<vmem>>, vector<2x2xf32>
    tpu.vector_store %arg5[%c0_10, %c0_11], %12 {strides = array<i32>} : memref<2x2xf32, #tpu.memory_space<vmem>>, vector<2x2xf32>,
    return
  }
}

</mosaic_0001>

<bundles_post_ra>
// kernel: tpu_custom_call.1
= control target key start
LH: loop header
LB: loop body
LE: loop exit
PB: predicated region body
PF: predicated region fallthrough
CT: control target
= control target key end

     0   :  { %7 = vsyncpa [#allocation3], 0  ;;  %s639_s0 = inlined_call_operand.hbm [shape: f32[1,128], index: 0, kind: input, shape index: {}]   ;;  %s640_s1 = inlined_call_operand.hbm [shape: f32[16,128], index: 1, kind: input, shape index: {}]   ;;  %s641_s2 = inlined_call_operand.hbm [shape: f32[16,128], index: 2, kind: output, shape index: {}]  }
   0x1   :  { %8 = vsyncpa [#allocation6], 0 }
   0x2   :  { %10 = vsyncpa [#allocation6 + $0x1], 0 }
   0x3   :  { %11 = vsyncpa [#allocation4], 0 }
   0x4   :  { %13 = vsyncpa [#allocation4 + $0x1], 0  ;;  %s501_s9 = smov 0   ;;  %s503_s10 = smov 0  }
   0x5   :  { %s505_s11 = smov 0   ;;  %s507_s12 = smov 0  }
   0x6 LB: > { %s522_s13 = sadd.s32 4294967295, %s483_s12   ;;  %s281_s14 = sadd.s32 4294967294, %s483_s12   ;;  %s483_s12 = sphi %s507_s12, %s651_s12   ;;  %s479_s11 = sphi %s505_s11, %s650_s11   ;;  %s475_s10 = sphi %s503_s10, %s649_s10   ;;  %s471_s9 = sphi %s501_s9, %s648_s9  }
   0x7   : > { %p60_p0 = scmp.ne.s32.totalorder %s475_s10, %s471_s9  ;;  %p61_p1 = scmp.eq.s32.totalorder %s522_s13, 0 }
   0x8   : > { %p84_p2 = scmp.eq.s32.totalorder %s522_s13, 1  ;;  %p90_p3 = scmp.eq.s32.totalorder %s281_s14, 1 }
   0x9   : > { %p531_p4 = por %p61_p1, %p60_p0  ;;  %p282_p5 = scmp.ge.s32.totalorder %s483_s12, 1 }
   0xa   : > { %p536_p6 = por %p90_p3, %p60_p0  ;;  %p97_p7 = scmp.lt.s32.totalorder %s483_s12, 3 }
   0xb   : > { %s109_s19 = sshll.u32 %s639_s0, 4  ;;  %s485_s21 = smov [#allocation2]   ;;  %s110_s19 = int_to_ptr.hbm [resolvable:$true] %s109_s19 }
   0xc   : > { %p544_p8 = pnand %p282_p5, %p97_p7  ;;  %s111_s22 = sshll.u32 %s485_s21, 4  ;;  %s112_s22 = int_to_ptr.vmem [resolvable:$true] %s111_s22 }
   0xd   : > { %s554_s23 = sadd.s32 1, %s483_s12   ;;  %s47_s24 = sadd.s32 1, %s479_s11 }
   0xe   : > { %p303_p10 = pneg %p544_p8  ;;  %s44_s25 = ssub.s32 %s483_s12, %s554_s23 }
   0xf   : > { %p45_p12 = scmp.eq.s32.totalorder %s44_s25, 0  ;;  %p54_p13 = scmp.ne.s32.totalorder %s479_s11, %s475_s10 }
  0x10   : > { %p304_p11 = pnand %p303_p10, %p61_p1  ;;  %p55_p0 = scmp.eq.s32.totalorder %s483_s12, 0 }
  0x11   : > { %s563_s26 = scalar_select %p45_p12, %s479_s11, %s47_s24  }
  0x12   : > { %306 = dma.hbm_to_vmem [thread:$0]  (!%p304_p11), %s110_s19, 16, %s112_s22, [#allocation3]  }
  0x13   : > { %p567_p3 = por %p84_p2, %p54_p13  ;;  %p316_p5 = scmp.lt.s32.totalorder %s483_s12, 2 }
  0x14   : > { %s122_s28 = sand.u32 1, %s479_s11   ;;  %s286_s29 = sshll.u32 %s483_s12, 3 }
  0x15   : > { %p56_p7 = por %p55_p0, %p54_p13  ;;  %s285_s30 = sshll.u32 %s122_s28, 3 }
  0x16   : > { %s130_s5 = scalar_lea.hbm %s640_s1, %s286_s29  ;;  %s126_s7 = scalar_lea.vmem [#allocation5], %s285_s30 }
  0x17   : > { %s132_s6 = sshll.u32 %s130_s5, 4  ;;  %s134_s8 = sshll.u32 %s126_s7, 4  ;;  %s133_s6 = int_to_ptr.hbm [resolvable:$true] %s132_s6  ;;  %s135_s8 = int_to_ptr.vmem [resolvable:$true] %s134_s8 }
  0x18   : > { %p577_p10 = pnand %p316_p5, %p56_p7  ;;  %s123_s17 = scalar_lea.sflag [#allocation6], %s122_s28 }
  0x19   : > { %s383_s18 = sshra.s32 %s133_s6, 4  ;;  %s390_s24 = scalar_lea.hbm %s640_s1, 16  ;;  %s384_s18 = int_to_ptr.hbm [resolvable:$true] %s383_s18 }
  0x1a   : > { %s385_s19 = scalar_lea.hbm %s384_s18, 8  ;;  %p387_p11 = pneg %p577_p10 }
  0x1b   : > { %p386_p2 = scmp.ne.s32.totalorder %s384_s18, %s385_s19  ;;  %p391_p0 = scmp.lt.s32.totalorder %s384_s18, %s640_s1 }
  0x1c   : > { %p392_p5 = scmp.lt.s32.totalorder %s390_s24, %s385_s19 }
  0x1d   : > { %p388_p12 = pnand %p387_p11, %p386_p2 }
  0x1e   : > { %p393_p7 = por %p392_p5, %p391_p0 }
  0x1f   : > { %p389_p13 = pneg %p388_p12 }
  0x21   : > { %p394_p9 = pnand %p393_p7, %p389_p13 }
  0x23   : > { %397 = shalt.err (!%p394_p9)
}
  0x24   : > { %310 = dma.hbm_to_vmem [thread:$0]  (!%p577_p10), %s133_s6, 128, %s135_s8, %s123_s17  }
  0x25   : > { %143 = sbr.rel (%p544_p8) target bundleno = 62 (0x3e), region = 28 }
  0x2a   : > { %458 = dma.done.wait (%p61_p1), [#allocation3], 16  }
  0x2b   : > { %460 = vsyncadd (%p61_p1), [#allocation3], 4294967280  ;;  %s598_s28 = sand.u32 1, %s475_s10  }
  0x2c   : > { %s289_s30 = sshll.u32 %s598_s28, 3  ;;  %s151_s3 = scalar_lea.sflag [#allocation6], %s598_s28 }
  0x2d   : > { %s154_s4 = scalar_lea.vmem [#allocation5], %s289_s30 }
  0x2e   : > { %462 = dma.done.wait (%p531_p4), %s151_s3, 128  }
  0x2f   : > { %464 = vsyncadd (%p531_p4), %s151_s3, 4294967168  ;;  %s292_s20 = sshll.u32 %s522_s13, 3  ;;  %s175_s8 = scalar_lea.vmem [#allocation7], %s289_s30  ;;  %v176_v0 = vld [vmem:[%s154_s4] sm:$0xff]  ;;  %v352_v1 = vld [vmem:[#allocation2] ss:$0 sm:$0xff] }
  0x30   : > { %s194_s7 = scalar_lea.hbm %s641_s2, %s292_s20  ;;  %s196_s14 = sshll.u32 %s175_s8, 4  ;;  %v181_v2 = vadd.f32 %v352_v1, %v176_v0  ;;  %s197_s14 = int_to_ptr.vmem [resolvable:$true] %s196_s14 }
  0x31   : > { %s198_s17 = sshll.u32 %s194_s7, 4  ;;  %s184_s18 = scalar_lea.sflag [#allocation4], %s598_s28  ;;  %s199_s17 = int_to_ptr.hbm [resolvable:$true] %s198_s17 }
  0x32   : > { %182 = vst [vmem:[%s175_s8] sm:$0xff] %v181_v2  ;;  %s427_s15 = sshra.s32 %s199_s17, 4  ;;  %s433_s22 = scalar_lea.hbm %s641_s2, 16  ;;  %s428_s15 = int_to_ptr.hbm [resolvable:$true] %s427_s15 }
  0x33   : > { %s429_s19 = scalar_lea.hbm %s428_s15, 8  ;;  %p434_p9 = scmp.lt.s32.totalorder %s428_s15, %s641_s2 }
  0x34   : > { %p430_p1 = scmp.ne.s32.totalorder %s428_s15, %s429_s19  ;;  %p435_p10 = scmp.lt.s32.totalorder %s433_s22, %s429_s19 }
  0x36   : > { %p431_p4 = pnand %p430_p1, %p567_p3  ;;  %p436_p2 = por %p435_p10, %p434_p9 }
  0x38   : > { %p432_p8 = pneg %p431_p4 }
  0x3a   : > { %p437_p11 = pnand %p436_p2, %p432_p8 }
  0x3c   : > { %440 = shalt.err (!%p437_p11)
}
  0x3d   : > { %301 = dma.vmem_to_hbm [thread:$0]  (%p567_p3), %s197_s14, 128, %s199_s17, %s184_s18  }
  0x3e PF: > { %s210_s29 = sand.u32 1, %s471_s9   ;;  %p647_p12 = scmp.ge.s32.totalorder %s483_s12, 2 }
  0x3f   : > { %s211_s28 = scalar_lea.sflag [#allocation4], %s210_s29 }
  0x40   : > { %p312_p13 = pnand %p647_p12, %p536_p6 }
  0x42   : > { %p313_p0 = pneg %p312_p13 }
  0x44   : > { %466 = dma.done.wait (%p313_p0), %s211_s28, 128  }
  0x45   : > { %468 = vsyncadd (%p313_p0), %s211_s28, 4294967168  ;;  %p16_p5 = scmp.ge.s32.totalorder %s554_s23, 4   ;;  %s648_s9 = smov %s475_s10 }
  0x46   : > { %s649_s10 = smov %s479_s11  ;;  %s650_s11 = smov %s563_s26 }
  0x47   : > { %s651_s12 = smov %s554_s23  ;;  %18 = sbr.rel (!%p16_p5) target bundleno = 6 (0x6), region = 78 }
  0x4c   :  { %217 = vsyncpa [#allocation3], 1 }
  0x4d   :  { %219 = vsyncpa [#allocation3 + $0x1], 1 }
  0x4e   :  { %220 = vsyncpa [#allocation6], 1 }
  0x4f   :  { %222 = vsyncpa [#allocation6 + $0x1], 1 }
  0x50   :  { %223 = vsyncpa [#allocation4], 1 }
  0x51   :  { %225 = vsyncpa [#allocation4 + $0x1], 1 }

// kernel: multi_task_bert_forward.8
= control target key start
LH: loop header
LB: loop body
LE: loop exit
PB: predicated region body
PF: predicated region fallthrough
CT: control target
= control target key end

     0   :  { %vm18_vm0 = vcmask 261120   ;;  %v98_v4 = vmov 32.0   ;;  %vm82_vm6 = vcmask 257024   ;;  %s141_s0 = inlined_call_operand.vmem [shape: f32[16,32], index: 0, kind: input, shape index: {}]   ;;  %s142_s1 = inlined_call_operand.vmem [shape: f32[1,32], index: 1, kind: input, shape index: {}]   ;;  %s143_s2 = inlined_call_operand.vmem [shape: f32[1,32], index: 2, kind: input, shape index: {}]   ;;  %s144_s3 = inlined_call_operand.vmem [shape: bf16[16,32], index: 3, kind: output, shape index: {}]  }
   0x1   :  { %v14_v0 = vld [vmem:[%s141_s0] sm:$0xff]  ;;  %v15_v2 = vld [vmem:[%s141_s0 + $0x8] sm:$0xff]  ;;  %92 = vrcp.f32 %v98_v4 }
   0x2   :  { %v19_v1 = vsel %vm18_vm0, %v14_v0, 0.0  ;;  %v22_v3 = vsel %vm18_vm0, %v15_v2, 0.0  ;;  %v90_v35 = vld [vmem:[%s142_s1] ss:$0 sm:$0xff] }
   0x3   :  { %20 = vadd.xlane.f32.xlu0 %v19_v1  ;;  %v91_v38 = vld [vmem:[%s143_s2] ss:$0 sm:$0xff] }
   0x7   :  { %v93_v5 = vpop.eup %92 }
   0x8   :  { %v26_v6 = vmul.f32 32.0, %v93_v5  ;;  %vm30_vm1 = vweird.f32 %v93_v5 }
   0xa   :  { %v27_v7 = vsub.f32 1.0, %v26_v6 }
   0xb   :  { %23 = vadd.xlane.f32.xlu0 %v22_v3 }
   0xc   :  { %v28_v8 = vmul.f32 %v93_v5, %v27_v7 }
   0xe   :  { %v29_v9 = vadd.f32 %v93_v5, %v28_v8 }
  0x10   :  { %v31_v10 = vsel %vm30_vm1, %v93_v5, %v29_v9 }
  0x76   :  { %v21_v11 = vpop.xlane.xlu0 %20 }
  0x77   :  { %v32_v12 = vmul.f32 %v31_v10, %v21_v11 }
  0x79   :  { %v34_v13 = vsub.f32 %v14_v0, %v32_v12 }
  0x7b   :  { %v36_v14 = vmul.f32 %v34_v13, %v34_v13 }
  0x7d   :  { %v38_v15 = vsel %vm18_vm0, %v36_v14, 0.0 }
  0x7e   :  { %39 = vadd.xlane.f32.xlu1 %v38_v15  ;;  %v24_v16 = vpop.xlane.xlu0 %23 }
  0x7f   :  { %v33_v17 = vmul.f32 %v31_v10, %v24_v16 }
  0x81   :  { %v35_v18 = vsub.f32 %v15_v2, %v33_v17 }
  0x83   :  { %v37_v19 = vmul.f32 %v35_v18, %v35_v18 }
  0x85   :  { %v41_v20 = vsel %vm18_vm0, %v37_v19, 0.0 }
  0x86   :  { %42 = vadd.xlane.f32.xlu1 %v41_v20 }
  0xf1   :  { %v40_v21 = vpop.xlane.xlu1 %39 }
  0xf2   :  { %v44_v22 = vmul.f32 %v40_v21, %v31_v10 }
  0xf4   :  { %v46_v23 = vadd.f32 1e-12, %v44_v22 }
  0xf6   :  { %94 = vrsqrt.f32 %v46_v23  ;;  %vm54_vm3 = vweird.f32 %v46_v23 }
  0xf9   :  { %v43_v24 = vpop.xlane.xlu1 %42 }
  0xfa   :  { %v45_v25 = vmul.f32 %v43_v24, %v31_v10 }
  0xfc   :  { %v95_v26 = vpop.eup %94  ;;  %v47_v27 = vadd.f32 1e-12, %v45_v25 }
  0xfd   :  { %v49_v28 = vmul.f32 %v95_v26, %v46_v23  ;;  %vm55_vm2 = vweird.f32 %v95_v26 }
  0xfe   :  { %96 = vrsqrt.f32 %v47_v27  ;;  %vm56_vm4 = vmor %vm54_vm3, %vm55_vm2  ;;  %vm64_vm7 = vweird.f32 %v47_v27 }
  0xff   :  { %v50_v29 = vmul.f32 %v95_v26, %v49_v28 }
 0x101   :  { %v51_v30 = vmul.f32 0.5, %v50_v29 }
 0x103   :  { %v52_v31 = vsub.f32 1.5, %v51_v30 }
 0x104   :  { %v97_v32 = vpop.eup %96 }
 0x105   :  { %v53_v33 = vmul.f32 %v95_v26, %v52_v31  ;;  %v59_v34 = vmul.f32 %v97_v32, %v47_v27  ;;  %vm65_vm5 = vweird.f32 %v97_v32 }
 0x106   :  { %vm66_vm8 = vmor %vm64_vm7, %vm65_vm5 }
 0x107   :  { %v57_v36 = vsel %vm56_vm4, %v95_v26, %v53_v33  ;;  %v60_v37 = vmul.f32 %v97_v32, %v59_v34 }
 0x108   :  { %v68_v39 = vmul.f32 %v57_v36, %v34_v13 }
 0x109   :  { %v61_v40 = vmul.f32 0.5, %v60_v37 }
 0x10a   :  { %v73_v41 = vmul.f32 %v90_v35, %v68_v39 }
 0x10b   :  { %v62_v42 = vsub.f32 1.5, %v61_v40 }
 0x10c   :  { %v78_v43 = vadd.f32 %v91_v38, %v73_v41 }
 0x10d   :  { %v63_v44 = vmul.f32 %v97_v32, %v62_v42 }
 0x10e   :  { %v80_v45 = vpack.c.bf16 %v78_v43, %v78_v43 }
 0x10f   :  { %v67_v46 = vsel %vm66_vm8, %v97_v32, %v63_v44 }
 0x110   :  { %83 = vst.msk [vmem:[%s144_s3] sm:$0xf] %vm82_vm6, %v80_v45  ;;  %v69_v47 = vmul.f32 %v67_v46, %v35_v18 }
 0x112   :  { %v74_v48 = vmul.f32 %v90_v35, %v69_v47 }
 0x114   :  { %v79_v49 = vadd.f32 %v91_v38, %v74_v48 }
 0x116   :  { %v81_v50 = vpack.c.bf16 %v79_v49, %v79_v49 }
 0x118   :  { %84 = vst.msk [vmem:[%s144_s3 + $0x4] sm:$0xf] %vm82_vm6, %v81_v50 }

// kernel: multi_task_bert_forward.10
= control target key start
LH: loop header
LB: loop body
LE: loop exit
PB: predicated region body
PF: predicated region fallthrough
CT: control target
= control target key end

     0   :  { %vm51_vm0 = vcmask 261120   ;;  %v177_v15 = vmov 32.0   ;;  %vm140_vm6 = vcmask 257024   ;;  %s245_s2 = inlined_call_operand.vmem [shape: bf16[32,32], index: 2, kind: input, shape index: {}]   ;;  %s246_s3 = inlined_call_operand.vmem [shape: f32[1,32], index: 3, kind: input, shape index: {}]   ;;  %s247_s0 = inlined_call_operand.vmem [shape: bf16[16,32], index: 0, kind: input, shape index: {}]   ;;  %s248_s1 = inlined_call_operand.vmem [shape: bf16[16,32], index: 1, kind: input, shape index: {}]   ;;  %s249_s4 = inlined_call_operand.vmem [shape: f32[1,32], index: 4, kind: input, shape index: {}]   ;;  %s250_s5 = inlined_call_operand.vmem [shape: f32[1,32], index: 5, kind: input, shape index: {}]   ;;  %s251_s6 = inlined_call_operand.vmem [shape: bf16[16,32], index: 6, kind: output, shape index: {}]  }
   0x1   :  { %v162_v0 = vld [vmem:[%s245_s2 + $0x8] sm:$0xff]  ;;  %v161_v1 = vld [vmem:[%s245_s2] sm:$0xff]  ;;  %171 = vrcp.f32 %v177_v15 }
   0x2   :  { %61 = vmatpush.bf16.msra.mxu0 %v162_v0  ;;  %v160_v2 = vld [vmem:[%s247_s0] sm:$0xff] }
   0x3   :  { %v164_v3 = vld [vmem:[%s248_s1] sm:$0xff]  }
   0x4   :  { %v168_v4 = vld [vmem:[%s246_s3] ss:$0 sm:$0xff]  ;;  %v165_v5 = vunpack.c.l.bf16 %v164_v3  ;;  %v166_v10 = vunpack.c.h.bf16 %v164_v3 }
   0x5   :  { %v169_v46 = vld [vmem:[%s249_s4] ss:$0 sm:$0xff] }
   0x6   :  { %62 = vmatpush.bf16.msra.mxu0 %v161_v1  ;;  %v170_v49 = vld [vmem:[%s250_s5] ss:$0 sm:$0xff] }
   0x7   :  { %v172_v16 = vpop.eup %171 }
   0x8   :  { %v84_v17 = vmul.f32 32.0, %v172_v16  ;;  %vm88_vm1 = vweird.f32 %v172_v16 }
   0x9   :  { %159 = vmatmul.msk.bf16.vlgmr.msra.gmra.mxu0 %vm51_vm0, %v160_v2 }
   0xa   :  { %v85_v18 = vsub.f32 1.0, %v84_v17 }
   0xc   :  { %v86_v19 = vmul.f32 %v172_v16, %v85_v18 }
   0xe   :  { %v87_v20 = vadd.f32 %v172_v16, %v86_v19 }
  0x10   :  { %v89_v21 = vsel %vm88_vm1, %v172_v16, %v87_v20 }
  0x86   :  { %v64_v6 = vpop.f32.mrf.mxu0 }
  0x87   :  { %v65_v7 = vadd.f32 %v168_v4, %v64_v6 }
  0x89   :  { %v73_v8 = vadd.f32 %v165_v5, %v65_v7 }
  0x8b   :  { %v77_v9 = vsel %vm51_vm0, %v73_v8, 0.0 }
  0x8c   :  { %78 = vadd.xlane.f32.xlu0 %v77_v9 }
  0x8e   :  { %v66_v11 = vpop.f32.mrf.mxu0 }
  0x8f   :  { %v67_v12 = vadd.f32 %v168_v4, %v66_v11 }
  0x91   :  { %v74_v13 = vadd.f32 %v166_v10, %v67_v12 }
  0x93   :  { %v80_v14 = vsel %vm51_vm0, %v74_v13, 0.0 }
  0x94   :  { %81 = vadd.xlane.f32.xlu0 %v80_v14 }
  0xff   :  { %v79_v22 = vpop.xlane.xlu0 %78 }
 0x100   :  { %v90_v23 = vmul.f32 %v89_v21, %v79_v22 }
 0x102   :  { %v92_v24 = vsub.f32 %v73_v8, %v90_v23 }
 0x104   :  { %v94_v25 = vmul.f32 %v92_v24, %v92_v24 }
 0x106   :  { %v96_v26 = vsel %vm51_vm0, %v94_v25, 0.0 }
 0x107   :  { %97 = vadd.xlane.f32.xlu1 %v96_v26  ;;  %v82_v27 = vpop.xlane.xlu0 %81 }
 0x108   :  { %v91_v28 = vmul.f32 %v89_v21, %v82_v27 }
 0x10a   :  { %v93_v29 = vsub.f32 %v74_v13, %v91_v28 }
 0x10c   :  { %v95_v30 = vmul.f32 %v93_v29, %v93_v29 }
 0x10e   :  { %v99_v31 = vsel %vm51_vm0, %v95_v30, 0.0 }
 0x10f   :  { %100 = vadd.xlane.f32.xlu1 %v99_v31 }
 0x17a   :  { %v98_v32 = vpop.xlane.xlu1 %97 }
 0x17b   :  { %v102_v33 = vmul.f32 %v98_v32, %v89_v21 }
 0x17d   :  { %v104_v34 = vadd.f32 1e-12, %v102_v33 }
 0x17f   :  { %173 = vrsqrt.f32 %v104_v34  ;;  %vm112_vm3 = vweird.f32 %v104_v34 }
 0x182   :  { %v101_v35 = vpop.xlane.xlu1 %100 }
 0x183   :  { %v103_v36 = vmul.f32 %v101_v35, %v89_v21 }
 0x185   :  { %v174_v37 = vpop.eup %173  ;;  %v105_v38 = vadd.f32 1e-12, %v103_v36 }
 0x186   :  { %v107_v39 = vmul.f32 %v174_v37, %v104_v34  ;;  %vm113_vm2 = vweird.f32 %v174_v37 }
 0x187   :  { %175 = vrsqrt.f32 %v105_v38  ;;  %vm114_vm4 = vmor %vm112_vm3, %vm113_vm2  ;;  %vm122_vm7 = vweird.f32 %v105_v38 }
 0x188   :  { %v108_v40 = vmul.f32 %v174_v37, %v107_v39 }
 0x18a   :  { %v109_v41 = vmul.f32 0.5, %v108_v40 }
 0x18c   :  { %v110_v42 = vsub.f32 1.5, %v109_v41 }
 0x18d   :  { %v176_v43 = vpop.eup %175 }
 0x18e   :  { %v111_v44 = vmul.f32 %v174_v37, %v110_v42  ;;  %v117_v45 = vmul.f32 %v176_v43, %v105_v38  ;;  %vm123_vm5 = vweird.f32 %v176_v43 }
 0x18f   :  { %vm124_vm8 = vmor %vm122_vm7, %vm123_vm5 }
 0x190   :  { %v115_v47 = vsel %vm114_vm4, %v174_v37, %v111_v44  ;;  %v118_v48 = vmul.f32 %v176_v43, %v117_v45 }
 0x191   :  { %v126_v50 = vmul.f32 %v115_v47, %v92_v24 }
 0x192   :  { %v119_v51 = vmul.f32 0.5, %v118_v48 }
 0x193   :  { %v131_v52 = vmul.f32 %v169_v46, %v126_v50 }
 0x194   :  { %v120_v53 = vsub.f32 1.5, %v119_v51 }
 0x195   :  { %v136_v54 = vadd.f32 %v170_v49, %v131_v52 }
 0x196   :  { %v121_v55 = vmul.f32 %v176_v43, %v120_v53 }
 0x197   :  { %v138_v56 = vpack.c.bf16 %v136_v54, %v136_v54 }
 0x198   :  { %v125_v57 = vsel %vm124_vm8, %v176_v43, %v121_v55 }
 0x199   :  { %141 = vst.msk [vmem:[%s251_s6] sm:$0xf] %vm140_vm6, %v138_v56  ;;  %v127_v58 = vmul.f32 %v125_v57, %v93_v29 }
 0x19b   :  { %v132_v59 = vmul.f32 %v169_v46, %v127_v58 }
 0x19d   :  { %v137_v60 = vadd.f32 %v170_v49, %v132_v59 }
 0x19f   :  { %v139_v61 = vpack.c.bf16 %v137_v60, %v137_v60 }
 0x1a1   :  { %142 = vst.msk [vmem:[%s251_s6 + $0x4] sm:$0xf] %vm140_vm6, %v139_v61 }

// kernel: multi_task_bert_forward.9
= control target key start
LH: loop header
LB: loop body
LE: loop exit
PB: predicated region body
PF: predicated region fallthrough
CT: control target
= control target key end

     0   :  { %s2043_s15 = smov 0   ;;  %s2345_s0 = inlined_call_operand.vmem [shape: bf16[2,8,32], index: 0, kind: input, shape index: {}]   ;;  %s2346_s1 = inlined_call_operand.vmem [shape: f32[2,1,8], index: 1, kind: input, shape index: {}]   ;;  %s2347_s2 = inlined_call_operand.vmem [shape: bf16[32,96], index: 2, kind: input, shape index: {}]   ;;  %s2348_s3 = inlined_call_operand.vmem [shape: f32[1,96], index: 3, kind: input, shape index: {}]   ;;  %s2349_s4 = inlined_call_operand.vmem [shape: bf16[2,8,32], index: 4, kind: output, shape index: {}]  }
   0x1 LB: > { %s1852_s16 = sadd.s32 4294967295, %s2006_s15   ;;  %p1856_p0 = scmp.ge.s32.totalorder %s2006_s15, 1  ;;  %s2006_s15 = sphi %s2043_s15, %s14_s15  }
   0x2   : > { %p169_p1 = scmp.lt.s32.totalorder %s2006_s15, 3 }
   0x4   : > { %p170_p2 = pnand %p1856_p0, %p169_p1 }
   0x5   : > { %p196_p3 = scmp.lt.s32.totalorder (!%p170_p2), %s1852_s16, 1  ;;  %s2008_s30 = smov (!%p170_p2), 112  }
   0x6   : > { %173 = sbr.rel (%p170_p2) target bundleno = 1960 (0x7a8), region = 36  ;;  %s2009_s5 = smov (!%p170_p2), 120  }
   0x7   : > { %s2010_s6 = smov (!%p170_p2), 104   ;;  %s2011_s7 = smov (!%p170_p2), 96  }
   0x8   : > { %s2014_s8 = smov (!%p170_p2), 64   ;;  %s2015_s11 = smov (!%p170_p2), 24  }
   0x9   : > { %s2016_s12 = smov (!%p170_p2), 16   ;;  %s2017_s13 = smov (!%p170_p2), 8  }
   0xb   : > { %v1879_v0 = vld [vmem:[%s2347_s2 + $0x8] sm:$0xff]  ;;  %v1878_v1 = vld [vmem:[%s2347_s2] sm:$0xff]  ;;  %s2351_s16 = smov (!%p196_p3, %s1852_s16), 1  ;;  %vm229_vm0 = vcmask 261120   ;;  %v2012_v17 = vmov 1983009808  }
   0xc   : > { %239 = vmatpush.bf16.msra.mxu0 %v1879_v0  ;;  %s1857_s21 = sshll.u32 %s2351_s16, 2  ;;  %s202_s24 = scalar_lea.vmem %s2346_s1, %s2351_s16  ;;  %v1983_v3 = vld [vmem:[%s2348_s3] ss:$0 sm:$0xff]  ;;  %v263_v18 = vunpack.c.l.s4 %v2012_v17  ;;  %v2013_v20 = vmov 1934713408   ;;  %vm258_vm1 = vcmask 1047556  }
   0xd   : > { %s199_s27 = scalar_lea.vmem %s2345_s0, %s1857_s21  ;;  %v287_v21 = vunpack.c.l.s4 %v2013_v20  ;;  %vm938_vm2 = vcmask 1043456   ;;  %vm934_vm3 = vcmask 64512   ;;  %vm1783_vm4 = vcmask 130048   ;;  %s206_s18 = scalar_lea.vmem %s2349_s4, %s1857_s21 }
   0xe   : > { %v208_v2 = vld [vmem:[%s199_s27] sm:$0xf]  ;;  %v2085_v26 = vunpack.c.0.s8 %v263_v18  ;;  %vm1785_vm5 = vcmask 195584   ;;  %vm1788_vm6 = vcmask 257024  }
   0xf   : > { %v2092_v34 = vunpack.c.0.s8 %v287_v21 }
  0x10   : > { %240 = vmatpush.bf16.msra.mxu0 %v1878_v1 }
  0x13   : > { %1867 = vmatmul.msk.bf16.vlgmr.msra.gmra.mxu0 %vm229_vm0, %v208_v2 }
  0x90   : > { %v242_v4 = vpop.f32.mrf.mxu0 }
  0x91   : > { %v243_v5 = vadd.f32 %v1983_v3, %v242_v4 }
  0x93   : > { %325 = vrot.lane.b32.xlu1 %v243_v5, %s2008_s30  ;;  %323 = vrot.lane.b32.xlu0 %v243_v5, %s2009_s5  ;;  %v2072_v6 = vmul.f32 0.35355338, %v243_v5 }
  0x95   : > { %251 = vrot.lane.b32.xlu2 %v2072_v6, %s2008_s30 }
  0x98   : > { %v244_v7 = vpop.f32.mrf.mxu0 }
  0x9b   : > { %327 = vrot.lane.b32.xlu0 %v243_v5, %s2010_s6 }
  0xa3   : > { %248 = vrot.lane.b32.xlu0 %v2072_v6, %s2009_s5 }
  0xef   : > { %v2083_v13 = vpop.permute.xlu2 %251 }
 0x105   : > { %v324_v8 = vpop.permute.xlu0 %323  ;;  %v326_v10 = vpop.permute.xlu1 %325 }
 0x106   : > { %v2077_v9 = vpack.i.bf16 %v243_v5, %v324_v8 }
 0x108   : > { %1901 = vrot.lane.b32.xlu1 %v2077_v9, %s2011_s7 }
 0x10d   : > { %v328_v11 = vpop.permute.xlu0 %327 }
 0x10e   : > { %v2080_v12 = vpack.i.bf16 %v326_v10, %v328_v11 }
 0x110   : > { %1906 = vrot.lane.b32.xlu2 %v2080_v12, %s2011_s7 }
 0x115   : > { %v2111_v2 = vpop.permute.xlu0 %248 }
 0x16a   : > { %v1907_v14 = vpop.permute.xlu2 %1906 }
 0x16b   : > { %v1909_v15 = vunpack.i.h.bf16 %v1907_v14  ;;  %v1908_v16 = vunpack.i.l.bf16 %v1907_v14 }
 0x16d   : > { %v341_v22 = vrot.slane %v1909_v15, 4  ;;  %v353_v23 = vrot.slane %v1908_v16, 4 }
 0x17a   : > { %v1902_v19 = vpop.permute.xlu1 %1901 }
 0x17b   : > { %v1904_v24 = vunpack.i.h.bf16 %v1902_v19  ;;  %v1903_v25 = vunpack.i.l.bf16 %v1902_v19 }
 0x17d   : > { %v343_v27 = vrot.slane %v1904_v24, 4  ;;  %v342_v28 = vsel %vm258_vm1, %v341_v22, %v1904_v24  ;;  %v354_v29 = vsel %vm258_vm1, %v353_v23, %v1903_v25  ;;  %v355_v30 = vrot.slane %v1903_v25, 4 }
 0x17e   : > { %v360_v31 = vperm.slane %v354_v29, %v2085_v26  ;;  %v348_v35 = vperm.slane %v342_v28, %v2085_v26 }
 0x17f   : > { %v344_v32 = vsel %vm258_vm1, %v1909_v15, %v343_v27  ;;  %v356_v33 = vsel %vm258_vm1, %v1908_v16, %v355_v30 }
 0x180   : > { %v352_v36 = vperm.slane %v344_v32, %v2085_v26  ;;  %v364_v37 = vperm.slane %v356_v33, %v2085_v26  ;;  %v365_v38 = vrot.slane %v360_v31, 4  ;;  %v367_v53 = vrot.slane %v348_v35, 4 }
 0x182   : > { %v377_v39 = vrot.slane %v364_v37, 4  ;;  %v379_v40 = vrot.slane %v352_v36, 4  ;;  %v366_v41 = vsel %vm258_vm1, %v365_v38, %v348_v35  ;;  %v368_v60 = vsel %vm258_vm1, %v360_v31, %v367_v53 }
 0x183   : > { %v372_v42 = vperm.slane %v366_v41, %v2092_v34  ;;  %v376_v61 = vperm.slane %v368_v60, %v2092_v34 }
 0x184   : > { %v380_v43 = vsel %vm258_vm1, %v364_v37, %v379_v40  ;;  %v378_v44 = vsel %vm258_vm1, %v377_v39, %v352_v36 }
 0x185   : > { %v389_v45 = vrot.slane %v372_v42, 4  ;;  %v388_v46 = vperm.slane %v380_v43, %v2092_v34  ;;  %v384_v47 = vperm.slane %v378_v44, %v2092_v34  ;;  %v397_v51 = vpack.c.bf16 %v372_v42, %v372_v42 }
 0x186   : > { %v391_v62 = vrot.slane %v376_v61, 4  ;;  %v399_v0 = vpack.c.bf16 %v376_v61, %v376_v61 }
 0x187   : > { %v390_v48 = vsel %vm258_vm1, 0.0, %v389_v45  ;;  %v395_v49 = vrot.slane %v388_v46, 4  ;;  %v393_v50 = vrot.slane %v384_v47, 4  ;;  %v403_v56 = vpack.c.bf16 %v388_v46, %v388_v46 }
 0x188   : > { %v398_v52 = vpack.c.bf16 %v390_v48, %v390_v48  ;;  %v401_v59 = vpack.c.bf16 %v384_v47, %v384_v47  ;;  %v392_v63 = vsel %vm258_vm1, 0.0, %v391_v62 }
 0x189   : > { %v396_v54 = vsel %vm258_vm1, 0.0, %v395_v49  ;;  %v394_v55 = vsel %vm258_vm1, 0.0, %v393_v50  ;;  %v400_v1 = vpack.c.bf16 %v392_v63, %v392_v63 }
 0x18a   : > { %1916 = vxpose.binary.xlu0.c.b16.start.end [1/2] (short) (narrow) %v398_v52, %v397_v51, 16  ;;  %v404_v57 = vpack.c.bf16 %v396_v54, %v396_v54  ;;  %v402_v58 = vpack.c.bf16 %v394_v55, %v394_v55 }
 0x18c   : > { %1910 = vxpose.binary.xlu1.c.b16.start.end [1/2] (short) (narrow) %v404_v57, %v403_v56, 16 }
 0x18d   : > { %1913 = vxpose.binary.xlu2.c.b16.start.end [1/2] (short) (narrow) %v402_v58, %v401_v59, 16 }
 0x19d   : > { %1919 = vxpose.binary.xlu2.c.b16.start.end [1/2] (short) (narrow) %v400_v1, %v399_v0, 16  ;;  %v260_v1 = vrot.slane %v2072_v6, 4 }
 0x1e6   : > { %254 = vrot.lane.b32.xlu1 %v2072_v6, %s2010_s6 }
 0x22e   : > { %v1914_v3 = vpop.trf.xlu2 }
 0x22f   : > { %v666_v7 = vrot.slane %v1914_v3, 4 }
 0x236   : > { %v1915_v4 = vpop.trf.xlu2  ;;  %v1917_v5 = vpop.trf.xlu0 }
 0x237   : > { %v667_v10 = vsel %vm258_vm1, %v666_v7, %v1917_v5  ;;  %v694_v17 = vrot.slane %v1915_v4, 4  ;;  %v257_v4 = vrot.slane %v2083_v13, 4  ;;  %v261_v5 = vsel %vm258_vm1, %v2083_v13, %v260_v1 }
 0x238   : > { %v1911_v8 = vpop.trf.xlu1  ;;  %v671_v14 = vperm.slane %v667_v10, %v2085_v26  ;;  %v272_v7 = vrot.slane %v2111_v2, 4 }
 0x239   : > { %v672_v11 = vrot.slane %v1911_v8, 4 }
 0x23a   : > { %v680_v19 = vrot.slane %v671_v14, 4 }
 0x23e   : > { %v1920_v15 = vpop.trf.xlu2  ;;  %v1918_v16 = vpop.trf.xlu0 }
 0x23f   : > { %v673_v18 = vsel %vm258_vm1, %v672_v11, %v1920_v15  ;;  %v695_v22 = vsel %vm258_vm1, %v694_v17, %v1918_v16  ;;  %v269_v11 = vperm.slane %v261_v5, %v2085_v26 }
 0x240   : > { %v677_v20 = vperm.slane %v673_v18, %v2085_v26  ;;  %v1912_v21 = vpop.trf.xlu1  ;;  %v699_v28 = vperm.slane %v695_v22, %v2085_v26 }
 0x241   : > { %v700_v25 = vrot.slane %v1912_v21, 4  ;;  %v296_v16 = vrot.slane %v269_v11, 4 }
 0x242   : > { %v678_v23 = vrot.slane %v677_v20, 4  ;;  %v681_v24 = vsel %vm258_vm1, %v677_v20, %v680_v19  ;;  %v708_v33 = vrot.slane %v699_v28, 4 }
 0x243   : > { %v689_v29 = vperm.slane %v681_v24, %v2092_v34 }
 0x244   : > { %v679_v27 = vsel %vm258_vm1, %v678_v23, %v671_v14 }
 0x245   : > { %v685_v30 = vperm.slane %v679_v27, %v2092_v34  ;;  %v692_v36 = vrot.slane %v689_v29, 4  ;;  %v742_v42 = vshrl.u32 %v689_v29, 16 }
 0x246   : > { %v1921_v31 = vpop.trf.xlu2 }
 0x247   : > { %v701_v32 = vsel %vm258_vm1, %v700_v25, %v1921_v31  ;;  %v690_v39 = vrot.slane %v685_v30, 4  ;;  %v693_v45 = vsel %vm258_vm1, 0, %v692_v36  ;;  %v726_v62 = vshrl.u32 %v685_v30, 16 }
 0x248   : > { %v705_v35 = vperm.slane %v701_v32, %v2085_v26  ;;  %v750_v52 = vshrl.u32 %v693_v45, 16 }
 0x249   : > { %v691_v47 = vsel %vm258_vm1, 0, %v690_v39 }
 0x24a   : > { %v706_v37 = vrot.slane %v705_v35, 4  ;;  %v709_v38 = vsel %vm258_vm1, %v705_v35, %v708_v33  ;;  %v734_v57 = vshrl.u32 %v691_v47, 16 }
 0x24b   : > { %v717_v40 = vperm.slane %v709_v38, %v2092_v34 }
 0x24c   : > { %v707_v41 = vsel %vm258_vm1, %v706_v37, %v699_v28 }
 0x24d   : > { %v713_v43 = vperm.slane %v707_v41, %v2092_v34  ;;  %v743_v44 = vshrl.u32 %v717_v40, 16  ;;  %v720_v46 = vrot.slane %v717_v40, 4  ;;  %v740_v48 = vpack.i.b16 %v717_v40, %v689_v29 }
 0x24f   : > { %v744_v49 = vpack.i.b16 %v743_v44, %v742_v42  ;;  %v721_v50 = vsel %vm258_vm1, 0, %v720_v46  ;;  %v718_v51 = vrot.slane %v713_v43, 4  ;;  %v727_v61 = vshrl.u32 %v713_v43, 16 }
 0x250   : > { %v751_v53 = vshrl.u32 %v721_v50, 16  ;;  %v748_v55 = vpack.i.b16 %v721_v50, %v693_v45  ;;  %v724_v63 = vpack.i.b16 %v713_v43, %v685_v30 }
 0x251   : > { %1928 = vxpose.binary.xlu2.c.b16.start.end [1/2] (short) (narrow) %v744_v49, %v740_v48, 16  ;;  %v719_v54 = vsel %vm258_vm1, 0, %v718_v51  ;;  %v728_v0 = vpack.i.b16 %v727_v61, %v726_v62 }
 0x252   : > { %v752_v56 = vpack.i.b16 %v751_v53, %v750_v52  ;;  %v735_v58 = vshrl.u32 %v719_v54, 16  ;;  %v732_v59 = vpack.i.b16 %v719_v54, %v691_v47 }
 0x254   : > { %1922 = vxpose.binary.xlu1.c.b16.start.end [1/2] (short) (narrow) %v752_v56, %v748_v55, 16  ;;  %v736_v60 = vpack.i.b16 %v735_v58, %v734_v57 }
 0x256   : > { %1925 = vxpose.binary.xlu0.c.b16.start.end [1/2] (short) (narrow) %v736_v60, %v732_v59, 16 }
 0x258   : > { %v255_v3 = vpop.permute.xlu1 %254 }
 0x259   : > { %v270_v8 = vrot.slane %v255_v3, 4  ;;  %v273_v10 = vsel %vm258_vm1, %v255_v3, %v272_v7 }
 0x25b   : > { %v271_v14 = vsel %vm258_vm1, %v270_v8, %v2111_v2 }
 0x25c   : > { %v277_v13 = vperm.slane %v271_v14, %v2085_v26 }
 0x25e   : > { %v282_v21 = vrot.slane %v277_v13, 4 }
 0x266   : > { %1931 = vxpose.binary.xlu0.c.b16.start.end [1/2] (short) (narrow) %v728_v0, %v724_v63, 16 }
 0x2ba   : > { %1935 = vrot.lane.b32.xlu2 %v2077_v9, %s2014_s8  ;;  %v259_v9 = vsel %vm258_vm1, %v257_v4, %v2072_v6 }
 0x2bb   : > { %v265_v15 = vperm.slane %v259_v9, %v2085_v26 }
 0x2bd   : > { %v284_v19 = vrot.slane %v265_v15, 4  ;;  %v283_v25 = vsel %vm258_vm1, %v282_v21, %v265_v15 }
 0x2be   : > { %v289_v28 = vperm.slane %v283_v25, %v2092_v34 }
 0x2bf   : > { %v285_v22 = vsel %vm258_vm1, %v277_v13, %v284_v19 }
 0x2c0   : > { %v293_v23 = vperm.slane %v285_v22, %v2092_v34  ;;  %v306_v35 = vrot.slane %v289_v28, 4  ;;  %v314_v55 = vpack.c.bf16 %v289_v28, %v289_v28 }
 0x2c2   : > { %v308_v29 = vrot.slane %v293_v23, 4  ;;  %v307_v44 = vsel %vm258_vm1, 0.0, %v306_v35  ;;  %v316_v45 = vpack.c.bf16 %v293_v23, %v293_v23 }
 0x2c3   : > { %v315_v50 = vpack.c.bf16 %v307_v44, %v307_v44 }
 0x2c4   : > { %v309_v36 = vsel %vm258_vm1, 0.0, %v308_v29 }
 0x2c5   : > { %v317_v40 = vpack.c.bf16 %v309_v36, %v309_v36 }
 0x2d4   : > { %1940 = vrot.lane.b32.xlu0 %v2080_v12, %s2014_s8  ;;  %v281_v12 = vperm.slane %v273_v10, %v2085_v26 }
 0x2d6   : > { %v294_v17 = vrot.slane %v281_v12, 4  ;;  %v297_v18 = vsel %vm258_vm1, %v281_v12, %v296_v16 }
 0x2d7   : > { %v305_v20 = vperm.slane %v297_v18, %v2092_v34 }
 0x2d8   : > { %v295_v6 = vsel %vm258_vm1, %v294_v17, %v269_v11 }
 0x2d9   : > { %v301_v2 = vperm.slane %v295_v6, %v2092_v34  ;;  %v312_v24 = vrot.slane %v305_v20, 4  ;;  %v320_v38 = vpack.c.bf16 %v305_v20, %v305_v20 }
 0x2db   : > { %v310_v30 = vrot.slane %v301_v2, 4  ;;  %v313_v31 = vsel %vm258_vm1, 0.0, %v312_v24  ;;  %v318_v46 = vpack.c.bf16 %v301_v2, %v301_v2  ;;  %v492_v47 = vrot.slane %v320_v38, 4 }
 0x2dc   : > { %v321_v33 = vpack.c.bf16 %v313_v31, %v313_v31 }
 0x2dd   : > { %v311_v37 = vsel %vm258_vm1, 0.0, %v310_v30  ;;  %v485_v56 = vrot.slane %v318_v46, 4  ;;  %v493_v57 = vsel %vm258_vm1, %v492_v47, %v316_v45 }
 0x2de   : > { %v319_v41 = vpack.c.bf16 %v311_v37, %v311_v37  ;;  %v512_v42 = vrot.slane %v321_v33, 4  ;;  %v497_v0 = vperm.slane %v493_v57, %v2085_v26 }
 0x2df   : > { %v487_v4 = vsel %vm258_vm1, %v485_v56, %v314_v55 }
 0x2e0   : > { %v506_v51 = vrot.slane %v319_v41, 4  ;;  %v513_v53 = vsel %vm258_vm1, %v512_v42, %v317_v40  ;;  %v491_v12 = vperm.slane %v487_v4, %v2085_v26  ;;  %v498_v14 = vrot.slane %v497_v0, 4 }
 0x2e1   : > { %v517_v60 = vperm.slane %v513_v53, %v2085_v26 }
 0x2e2   : > { %v507_v62 = vsel %vm258_vm1, %v506_v51, %v315_v50  ;;  %v499_v19 = vsel %vm258_vm1, %v498_v14, %v491_v12 }
 0x2e3   : > { %v511_v7 = vperm.slane %v507_v62, %v2085_v26  ;;  %v518_v8 = vrot.slane %v517_v60, 4  ;;  %v503_v2 = vperm.slane %v499_v19, %v2092_v34 }
 0x2e5   : > { %v519_v13 = vsel %vm258_vm1, %v518_v8, %v511_v7 }
 0x2e6   : > { %v523_v22 = vperm.slane %v519_v13, %v2092_v34 }
 0x2e8   : > { %v530_v37 = vshrl.u32 %v523_v22, 16  ;;  %v528_v42 = vpack.i.b16 %v523_v22, %v503_v2 }
 0x2f2   : > { %v1929_v48 = vpop.trf.xlu2 }
 0x2f3   : > { %v882_v54 = vrot.slane %v1929_v48, 4 }
 0x2fa   : > { %v1930_v10 = vpop.trf.xlu2 }
 0x2fb   : > { %v902_v9 = vrot.slane %v1930_v10, 4 }
 0x300   : > { %v1923_v32 = vpop.trf.xlu1 }
 0x301   : > { %v888_v39 = vrot.slane %v1923_v32, 4  ;;  %v504_v32 = vrot.slane %v503_v2, 4 }
 0x302   : > { %v1926_v27 = vpop.trf.xlu0 }
 0x303   : > { %v889_v49 = vsel %vm258_vm1, %v888_v39, %v1926_v27  ;;  %v524_v27 = vrot.slane %v523_v22, 4  ;;  %v505_v48 = vsel %vm258_vm1, 0, %v504_v32 }
 0x304   : > { %v893_v58 = vperm.slane %v889_v49, %v2085_v26 }
 0x305   : > { %v525_v44 = vsel %vm258_vm1, 0, %v524_v27 }
 0x306   : > { %v894_v1 = vrot.slane %v893_v58, 4  ;;  %v534_v50 = vpack.i.b16 %v525_v44, %v505_v48  ;;  %v536_v51 = vshrl.u32 %v525_v44, 16 }
 0x308   : > { %v1924_v52 = vpop.trf.xlu1 }
 0x309   : > { %v908_v59 = vrot.slane %v1924_v52, 4  ;;  %v535_v52 = vshrl.u32 %v505_v48, 16 }
 0x30a   : > { %v1927_v43 = vpop.trf.xlu0 }
 0x30b   : > { %v909_v5 = vsel %vm258_vm1, %v908_v59, %v1927_v43  ;;  %v529_v43 = vshrl.u32 %v503_v2, 16  ;;  %v537_v53 = vpack.i.b16 %v536_v51, %v535_v52 }
 0x30c   : > { %v913_v15 = vperm.slane %v909_v5, %v2085_v26 }
 0x30d   : > { %v531_v47 = vpack.i.b16 %v530_v37, %v529_v43 }
 0x30e   : > { %v914_v20 = vrot.slane %v913_v15, 4 }
 0x312   : > { %v1932_v61 = vpop.trf.xlu0 }
 0x313   : > { %v883_v63 = vsel %vm258_vm1, %v882_v54, %v1932_v61 }
 0x314   : > { %v887_v3 = vperm.slane %v883_v63, %v2085_v26  ;;  %v1936_v54 = vpop.permute.xlu2 %1935 }
 0x315   : > { %v1938_v55 = vunpack.i.h.bf16 %v1936_v54  ;;  %v1937_v56 = vunpack.i.l.bf16 %v1936_v54 }
 0x316   : > { %v895_v11 = vsel %vm258_vm1, %v894_v1, %v887_v3 }
 0x317   : > { %v899_v16 = vperm.slane %v895_v11, %v2092_v34  ;;  %v419_v58 = vrot.slane %v1938_v55, 4  ;;  %v431_v59 = vrot.slane %v1937_v56, 4 }
 0x319   : > { %v900_v6 = vrot.slane %v899_v16, 4  ;;  %v925_v25 = vshrl.u32 %v899_v16, 16 }
 0x31a   : > { %v1933_v17 = vpop.trf.xlu0 }
 0x31b   : > { %v903_v18 = vsel %vm258_vm1, %v902_v9, %v1933_v17  ;;  %v901_v30 = vsel %vm258_vm1, 0, %v900_v6 }
 0x31c   : > { %v907_v21 = vperm.slane %v903_v18, %v2085_v26  ;;  %v931_v39 = vshrl.u32 %v901_v30, 16 }
 0x31e   : > { %v915_v23 = vsel %vm258_vm1, %v914_v20, %v907_v21 }
 0x31f   : > { %v919_v24 = vperm.slane %v915_v23, %v2092_v34 }
 0x321   : > { %v924_v28 = vpack.i.b16 %v919_v24, %v899_v16  ;;  %v926_v29 = vshrl.u32 %v919_v24, 16  ;;  %v920_v31 = vrot.slane %v919_v24, 4 }
 0x323   : > { %v940_v33 = vsel %vm938_vm2, %v924_v28, 0  ;;  %v927_v35 = vpack.i.b16 %v926_v29, %v925_v25  ;;  %v921_v36 = vsel %vm258_vm1, 0, %v920_v31 }
 0x324   : > { %949 = vmatpush.bf16.msra.mxu1 %v940_v33  ;;  %v930_v38 = vpack.i.b16 %v921_v36, %v901_v30  ;;  %v932_v40 = vshrl.u32 %v921_v36, 16  ;;  %v1982_v33 = vld [vmem:[%s202_s24] ss:$0 sm:$0xff] }
 0x325   : > { %v959_v41 = vsel %vm938_vm2, %v927_v35, 0 }
 0x326   : > { %968 = vmatpush.bf16.msra.mxu2 %v959_v41  ;;  %v978_v45 = vsel %vm938_vm2, %v930_v38, 0  ;;  %v933_v46 = vpack.i.b16 %v932_v40, %v931_v39 }
 0x327   : > { %1868 = vmatmul.msk.bf16.vlgmr.msra.gmra.mxu1 %vm934_vm3, %v528_v42  ;;  %987 = vmatpush.bf16.msra.mxu3 %v978_v45 }
 0x328   : > { %v997_v49 = vsel %vm938_vm2, %v933_v46, 0 }
 0x329   : > { %1869 = vmatmul.msk.bf16.vlgmr.msra.gmra.mxu2 %vm934_vm3, %v531_v47  ;;  %1006 = vmatpush.bf16.msrb.mxu1 %v997_v49 }
 0x32a   : > { %1870 = vmatmul.msk.bf16.vlgmr.msra.gmra.mxu3 %vm934_vm3, %v534_v50 }
 0x337   : > { %1871 = vmatmul.msk.bf16.vlgmr.msrb.gmra.mxu1 %vm934_vm3, %v537_v53 }
 0x346   : > { %v1941_v57 = vpop.permute.xlu0 %1940 }
 0x347   : > { %v1943_v60 = vunpack.i.h.bf16 %v1941_v57  ;;  %v1942_v61 = vunpack.i.l.bf16 %v1941_v57 }
 0x349   : > { %v417_v62 = vrot.slane %v1943_v60, 4  ;;  %v420_v63 = vsel %vm258_vm1, %v1943_v60, %v419_v58  ;;  %v429_v0 = vrot.slane %v1942_v61, 4  ;;  %v432_v1 = vsel %vm258_vm1, %v1942_v61, %v431_v59 }
 0x34a   : > { %v428_v3 = vperm.slane %v420_v63, %v2085_v26  ;;  %v440_v4 = vperm.slane %v432_v1, %v2085_v26 }
 0x34b   : > { %v418_v5 = vsel %vm258_vm1, %v417_v62, %v1938_v55  ;;  %v430_v7 = vsel %vm258_vm1, %v429_v0, %v1937_v56 }
 0x34c   : > { %v455_v8 = vrot.slane %v428_v3, 4  ;;  %v436_v10 = vperm.slane %v430_v7, %v2085_v26  ;;  %v453_v11 = vrot.slane %v440_v4, 4  ;;  %v424_v9 = vperm.slane %v418_v5, %v2085_v26 }
 0x34e   : > { %v441_v12 = vrot.slane %v436_v10, 4  ;;  %v454_v14 = vsel %vm258_vm1, %v453_v11, %v428_v3  ;;  %v456_v15 = vsel %vm258_vm1, %v440_v4, %v455_v8  ;;  %v443_v19 = vrot.slane %v424_v9, 4 }
 0x34f   : > { %v460_v16 = vperm.slane %v454_v14, %v2092_v34  ;;  %v464_v50 = vperm.slane %v456_v15, %v2092_v34 }
 0x350   : > { %v442_v13 = vsel %vm258_vm1, %v441_v12, %v424_v9  ;;  %v444_v25 = vsel %vm258_vm1, %v436_v10, %v443_v19 }
 0x351   : > { %v469_v17 = vrot.slane %v460_v16, 4  ;;  %v448_v18 = vperm.slane %v442_v13, %v2092_v34  ;;  %v477_v22 = vpack.c.bf16 %v460_v16, %v460_v16  ;;  %v452_v27 = vperm.slane %v444_v25, %v2092_v34 }
 0x352   : > { %v471_v51 = vrot.slane %v464_v50, 4  ;;  %v479_v53 = vpack.c.bf16 %v464_v50, %v464_v50 }
 0x353   : > { %v470_v20 = vsel %vm258_vm1, 0.0, %v469_v17  ;;  %v465_v21 = vrot.slane %v448_v18, 4  ;;  %v473_v2 = vpack.c.bf16 %v448_v18, %v448_v18  ;;  %v467_v28 = vrot.slane %v452_v27, 4 }
 0x354   : > { %v478_v6 = vpack.c.bf16 %v470_v20, %v470_v20  ;;  %v475_v30 = vpack.c.bf16 %v452_v27, %v452_v27  ;;  %v472_v52 = vsel %vm258_vm1, 0.0, %v471_v51 }
 0x355   : > { %v466_v23 = vsel %vm258_vm1, 0.0, %v465_v21  ;;  %v468_v29 = vsel %vm258_vm1, 0.0, %v467_v28  ;;  %v480_v54 = vpack.c.bf16 %v472_v52, %v472_v52 }
 0x356   : > { %1944 = vxpose.binary.xlu0.c.b16.start.end [1/2] (short) (narrow) %v478_v6, %v477_v22, 16  ;;  %v474_v24 = vpack.c.bf16 %v466_v23, %v466_v23  ;;  %v476_v31 = vpack.c.bf16 %v468_v29, %v468_v29 }
 0x358   : > { %1947 = vxpose.binary.xlu1.c.b16.start.end [1/2] (short) (narrow) %v474_v24, %v473_v2, 16 }
 0x366   : > { %1953 = vxpose.binary.xlu0.c.b16.start.end [1/2] (short) (narrow) %v476_v31, %v475_v30, 16 }
 0x3a4   : > { %v951_v32 = vpop.f32.mrf.mxu1 }
 0x3a5   : > { %v2221_v40 = vadd.f32 %v1982_v33, %v951_v32 }
 0x3a7   : > { %v1012_v44 = vsel %vm934_vm3, %v2221_v40, -inf }
 0x3ac   : > { %v953_v35 = vpop.f32.mrf.mxu1  ;;  %v970_v36 = vpop.f32.mrf.mxu2 }
 0x3ad   : > { %v989_v37 = vpop.f32.mrf.mxu3  ;;  %v971_v45 = vadd.f32 %v1982_v33, %v970_v36 }
 0x3ae   : > { %v990_v38 = vadd.f32 %v1982_v33, %v989_v37 }
 0x3af   : > { %v1015_v47 = vsel %vm934_vm3, %v971_v45, -inf }
 0x3b0   : > { %v1018_v39 = vsel %vm934_vm3, %v990_v38, -inf }
 0x3b1   : > { %1019 = vmax.xlane.f32.xlu2 %v1018_v39 }
 0x3b4   : > { %v972_v41 = vpop.f32.mrf.mxu2  ;;  %v1008_v42 = vpop.f32.mrf.mxu1 }
 0x3b5   : > { %v991_v43 = vpop.f32.mrf.mxu3  ;;  %v1009_v48 = vadd.f32 %v1982_v33, %v1008_v42 }
 0x3b7   : > { %v1021_v49 = vsel %vm934_vm3, %v1009_v48, -inf }
 0x3b8   : > { %1013 = vmax.xlane.f32.xlu1 %v1012_v44 }
 0x3bc   : > { %v1010_v46 = vpop.f32.mrf.mxu1 }
 0x3c0   : > { %1016 = vmax.xlane.f32.xlu1 %v1015_v47 }
 0x3c8   : > { %1022 = vmax.xlane.f32.xlu1 %v1021_v49 }
 0x3da   : > { %1950 = vxpose.binary.xlu2.c.b16.start.end [1/2] (short) (narrow) %v480_v54, %v479_v53, 16 }
 0x402   : > { %v1945_v9 = vpop.trf.xlu0 }
 0x403   : > { %v1188_v14 = vrot.slane %v1945_v9, 4 }
 0x404   : > { %v1948_v55 = vpop.trf.xlu1 }
 0x405   : > { %v1189_v15 = vsel %vm258_vm1, %v1188_v14, %v1948_v55 }
 0x406   : > { %v1193_v13 = vperm.slane %v1189_v15, %v2085_v26 }
 0x408   : > { %v1202_v21 = vrot.slane %v1193_v13, 4 }
 0x40a   : > { %v1946_v12 = vpop.trf.xlu0 }
 0x40b   : > { %v1216_v18 = vrot.slane %v1946_v12, 4 }
 0x40c   : > { %v1949_v56 = vpop.trf.xlu1 }
 0x40d   : > { %v1217_v6 = vsel %vm258_vm1, %v1216_v18, %v1949_v56 }
 0x40e   : > { %v1221_v24 = vperm.slane %v1217_v6, %v2085_v26 }
 0x410   : > { %v1230_v33 = vrot.slane %v1221_v24, 4 }
 0x412   : > { %v1954_v16 = vpop.trf.xlu0 }
 0x41a   : > { %v1955_v29 = vpop.trf.xlu0 }
 0x424   : > { %v1020_v60 = vpop.xlane.xlu2 %1019 }
 0x425   : > { %v1026_v62 = vsub.f32 %v990_v38, %v1020_v60 }
 0x427   : > { %v1032_v1 = vmul.f32 1.442695, %v1026_v62 }
 0x42b   : > { %v2229_v57 = vpop.xlane.xlu1 %1013 }
 0x433   : > { %v1017_v58 = vpop.xlane.xlu1 %1016 }
 0x434   : > { %v1025_v59 = vsub.f32 %v971_v45, %v1017_v58 }
 0x436   : > { %v1030_v61 = vmul.f32 1.442695, %v1025_v59 }
 0x438   : > { %1984 = vpow2.f32 %v1030_v61 }
 0x43b   : > { %v1023_v63 = vpop.xlane.xlu1 %1022 }
 0x43c   : > { %v1027_v0 = vsub.f32 %v1009_v48, %v1023_v63 }
 0x43e   : > { %v2231_v3 = vpop.eup %1984  ;;  %v1034_v4 = vmul.f32 1.442695, %v1027_v0 }
 0x43f   : > { %v1039_v5 = vsel %vm934_vm3, %v2231_v3, 0.0 }
 0x440   : > { %1986 = vpow2.f32 %v1034_v4  ;;  %1040 = vadd.xlane.f32.xlu1 %v1039_v5 }
 0x441   : > { %1988 = vpow2.f32 %v1032_v1 }
 0x446   : > { %v2235_v7 = vpop.eup %1986 }
 0x447   : > { %v2237_v8 = vpop.eup %1988  ;;  %v1045_v10 = vsel %vm934_vm3, %v2235_v7, 0.0 }
 0x448   : > { %1046 = vadd.xlane.f32.xlu1 %v1045_v10  ;;  %v1042_v11 = vsel %vm934_vm3, %v2237_v8, 0.0 }
 0x44b   : > { %1043 = vadd.xlane.f32.xlu2 %v1042_v11 }
 0x47b   : > { %v1951_v17 = vpop.trf.xlu2 }
 0x47c   : > { %v1194_v19 = vrot.slane %v1951_v17, 4 }
 0x47e   : > { %v1195_v20 = vsel %vm258_vm1, %v1194_v19, %v1954_v16 }
 0x47f   : > { %v1199_v22 = vperm.slane %v1195_v20, %v2085_v26 }
 0x481   : > { %v1200_v23 = vrot.slane %v1199_v22, 4  ;;  %v1203_v2 = vsel %vm258_vm1, %v1199_v22, %v1202_v21  ;;  %v1024_v22 = vsub.f32 %v2221_v40, %v2229_v57 }
 0x482   : > { %v1211_v27 = vperm.slane %v1203_v2, %v2092_v34 }
 0x483   : > { %v1201_v25 = vsel %vm258_vm1, %v1200_v23, %v1193_v13  ;;  %v1952_v28 = vpop.trf.xlu2  ;;  %v1028_v6 = vmul.f32 1.442695, %v1024_v22 }
 0x484   : > { %v1222_v30 = vrot.slane %v1952_v28, 4  ;;  %v2253_v31 = vperm.slane %v1201_v25, %v2092_v34  ;;  %v1214_v36 = vrot.slane %v1211_v27, 4  ;;  %v1264_v43 = vshrl.u32 %v1211_v27, 16 }
 0x486   : > { %v1223_v32 = vsel %vm258_vm1, %v1222_v30, %v1955_v29  ;;  %v1212_v39 = vrot.slane %v2253_v31, 4  ;;  %v1215_v44 = vsel %vm258_vm1, 0, %v1214_v36  ;;  %v1248_v50 = vshrl.u32 %v2253_v31, 16 }
 0x487   : > { %v1227_v35 = vperm.slane %v1223_v32, %v2085_v26  ;;  %v1272_v56 = vshrl.u32 %v1215_v44, 16 }
 0x488   : > { %v1213_v49 = vsel %vm258_vm1, 0, %v1212_v39 }
 0x489   : > { %v1228_v37 = vrot.slane %v1227_v35, 4  ;;  %v1231_v38 = vsel %vm258_vm1, %v1227_v35, %v1230_v33  ;;  %v1256_v61 = vshrl.u32 %v1213_v49, 16 }
 0x48a   : > { %v1239_v41 = vperm.slane %v1231_v38, %v2092_v34 }
 0x48b   : > { %v1229_v42 = vsel %vm258_vm1, %v1228_v37, %v1221_v24 }
 0x48c   : > { %v1235_v45 = vperm.slane %v1229_v42, %v2092_v34  ;;  %v1262_v46 = vpack.i.b16 %v1239_v41, %v1211_v27  ;;  %v1265_v47 = vshrl.u32 %v1239_v41, 16  ;;  %v1242_v48 = vrot.slane %v1239_v41, 4 }
 0x48e   : > { %v1266_v51 = vpack.i.b16 %v1265_v47, %v1264_v43  ;;  %v1243_v52 = vsel %vm258_vm1, 0, %v1242_v48  ;;  %v1240_v53 = vrot.slane %v1235_v45, 4  ;;  %v1246_v54 = vpack.i.b16 %v1235_v45, %v2253_v31 }
 0x48f   : > { %v1270_v55 = vpack.i.b16 %v1243_v52, %v1215_v44  ;;  %v1273_v58 = vshrl.u32 %v1243_v52, 16  ;;  %v1249_v59 = vshrl.u32 %v1235_v45, 16 }
 0x490   : > { %1962 = vxpose.binary.xlu2.c.b16.start.end [1/2] (short) (narrow) %v1266_v51, %v1262_v46, 16  ;;  %v1241_v60 = vsel %vm258_vm1, 0, %v1240_v53 }
 0x491   : > { %v1274_v62 = vpack.i.b16 %v1273_v58, %v1272_v56  ;;  %v1254_v63 = vpack.i.b16 %v1241_v60, %v1213_v49  ;;  %v1257_v0 = vshrl.u32 %v1241_v60, 16  ;;  %v1250_v1 = vpack.i.b16 %v1249_v59, %v1248_v50 }
 0x493   : > { %1956 = vxpose.binary.xlu0.c.b16.start.end [1/2] (short) (narrow) %v1274_v62, %v1270_v55, 16  ;;  %v1258_v4 = vpack.i.b16 %v1257_v0, %v1256_v61 }
 0x495   : > { %1959 = vxpose.binary.xlu1.c.b16.start.end [1/2] (short) (narrow) %v1258_v4, %v1254_v63, 16 }
 0x4b3   : > { %v1041_v5 = vpop.xlane.xlu1 %1040 }
 0x4b4   : > { %1990 = vrcp.f32 %v1041_v5 }
 0x4ba   : > { %v1991_v10 = vpop.eup %1990 }
 0x4bb   : > { %v1047_v11 = vpop.xlane.xlu1 %1046  ;;  %v1053_v9 = vmul.f32 %v1991_v10, %v2231_v3 }
 0x4bc   : > { %1992 = vrcp.f32 %v1047_v11 }
 0x4bd   : > { %v1057_v12 = vpack.c.bf16 %v1053_v9, %v1053_v9 }
 0x4be   : > { %v1044_v14 = vpop.xlane.xlu2 %1043 }
 0x4bf   : > { %1994 = vrcp.f32 %v1044_v14  ;;  %v1479_v15 = vsel %vm934_vm3, %v1057_v12, 0 }
 0x4c0   : > { %1488 = vmatpush.bf16.xpose.msrb.mxu3 %v1479_v15  ;;  %1996 = vpow2.f32 %v1028_v6 }
 0x4c2   : > { %v1993_v16 = vpop.eup %1992 }
 0x4c3   : > { %v1055_v13 = vmul.f32 %v1993_v16, %v2235_v7 }
 0x4c5   : > { %v1995_v17 = vpop.eup %1994  ;;  %v1059_v18 = vpack.c.bf16 %v1055_v13, %v1055_v13 }
 0x4c6   : > { %v1054_v19 = vmul.f32 %v1995_v17, %v2237_v8  ;;  %v1997_v23 = vpop.eup %1996 }
 0x4c7   : > { %v1517_v20 = vsel %vm934_vm3, %v1059_v18, 0  ;;  %v1036_v2 = vsel %vm934_vm3, %v1997_v23, 0.0 }
 0x4c8   : > { %1526 = vmatpush.bf16.xpose.msra.mxu1 %v1517_v20  ;;  %v1058_v21 = vpack.c.bf16 %v1054_v19, %v1054_v19 }
 0x4ca   : > { %v1498_v3 = vsel %vm934_vm3, %v1058_v21, 0 }
 0x4cb   : > { %1507 = vmatpush.bf16.xpose.msrb.mxu0 %v1498_v3 }
 0x504   : > { %1037 = vadd.xlane.f32.xlu0 %v1036_v2 }
 0x52d   : > { %1965 = vxpose.binary.xlu0.c.b16.start.end [1/2] (short) (narrow) %v1250_v1, %v1246_v54, 16 }
 0x531   : > { %v1963_v40 = vpop.trf.xlu2 }
 0x532   : > { %v1404_v32 = vrot.slane %v1963_v40, 4 }
 0x539   : > { %v1964_v42 = vpop.trf.xlu2 }
 0x53a   : > { %v1424_v45 = vrot.slane %v1964_v42, 4 }
 0x53f   : > { %v1957_v7 = vpop.trf.xlu0 }
 0x540   : > { %v1410_v31 = vrot.slane %v1957_v7, 4 }
 0x541   : > { %v1960_v30 = vpop.trf.xlu1 }
 0x542   : > { %v1411_v57 = vsel %vm258_vm1, %v1410_v31, %v1960_v30 }
 0x543   : > { %v1415_v33 = vperm.slane %v1411_v57, %v2085_v26 }
 0x545   : > { %v1416_v39 = vrot.slane %v1415_v33, 4 }
 0x547   : > { %v1958_v24 = vpop.trf.xlu0 }
 0x548   : > { %v1430_v35 = vrot.slane %v1958_v24, 4 }
 0x549   : > { %v1961_v36 = vpop.trf.xlu1 }
 0x54a   : > { %v1431_v43 = vsel %vm258_vm1, %v1430_v35, %v1961_v36 }
 0x54b   : > { %v1435_v46 = vperm.slane %v1431_v43, %v2085_v26 }
 0x54d   : > { %v1436_v50 = vrot.slane %v1435_v46, 4 }
 0x577   : > { %v1038_v8 = vpop.xlane.xlu0 %1037 }
 0x578   : > { %1998 = vrcp.f32 %v1038_v8 }
 0x57e   : > { %v1999_v25 = vpop.eup %1998 }
 0x57f   : > { %v1052_v27 = vmul.f32 %v1999_v25, %v1997_v23 }
 0x581   : > { %v1056_v28 = vpack.c.bf16 %v1052_v27, %v1052_v27 }
 0x583   : > { %v1460_v29 = vsel %vm934_vm3, %v1056_v28, 0 }
 0x584   : > { %1469 = vmatpush.bf16.xpose.msrb.mxu2 %v1460_v29 }
 0x5d9   : > { %v1966_v37 = vpop.trf.xlu0 }
 0x5da   : > { %v1405_v38 = vsel %vm258_vm1, %v1404_v32, %v1966_v37 }
 0x5db   : > { %v1409_v41 = vperm.slane %v1405_v38, %v2085_v26 }
 0x5dd   : > { %v1417_v44 = vsel %vm258_vm1, %v1416_v39, %v1409_v41 }
 0x5de   : > { %v1421_v47 = vperm.slane %v1417_v44, %v2092_v34 }
 0x5e0   : > { %v1422_v52 = vrot.slane %v1421_v47, 4  ;;  %v1447_v55 = vshrl.u32 %v1421_v47, 16 }
 0x5e1   : > { %v1967_v48 = vpop.trf.xlu0 }
 0x5e2   : > { %v1425_v49 = vsel %vm258_vm1, %v1424_v45, %v1967_v48  ;;  %v1423_v59 = vsel %vm258_vm1, 0, %v1422_v52 }
 0x5e3   : > { %v1429_v51 = vperm.slane %v1425_v49, %v2085_v26  ;;  %v1453_v0 = vshrl.u32 %v1423_v59, 16 }
 0x5e5   : > { %v1437_v53 = vsel %vm258_vm1, %v1436_v50, %v1429_v51 }
 0x5e6   : > { %v1441_v54 = vperm.slane %v1437_v53, %v2092_v34 }
 0x5e8   : > { %v1446_v56 = vpack.i.b16 %v1441_v54, %v1421_v47  ;;  %v1448_v58 = vshrl.u32 %v1441_v54, 16  ;;  %v1442_v60 = vrot.slane %v1441_v54, 4 }
 0x5ea   : > { %1872 = vmatmul.msk.bf16.vlgmr.msrb.gmra.mxu2 %vm934_vm3, %v1446_v56  ;;  %v1449_v61 = vpack.i.b16 %v1448_v58, %v1447_v55  ;;  %v1443_v62 = vsel %vm258_vm1, 0, %v1442_v60 }
 0x5eb   : > { %v1452_v63 = vpack.i.b16 %v1443_v62, %v1423_v59  ;;  %v1454_v1 = vshrl.u32 %v1443_v62, 16 }
 0x5ec   : > { %1873 = vmatmul.msk.bf16.vlgmr.msrb.gmra.mxu3 %vm934_vm3, %v1449_v61 }
 0x5ed   : > { %v1455_v4 = vpack.i.b16 %v1454_v1, %v1453_v0  ;;  %1874 = vmatmul.msk.bf16.vlgmr.msrb.gmra.mxu0 %vm934_vm3, %v1452_v63 }
 0x5ef   : > { %1875 = vmatmul.msk.bf16.vlgmr.msra.gmra.mxu1 %vm934_vm3, %v1455_v4 }
 0x66a   : > { %v1509_v5 = vpop.f32.mrf.mxu0 }
 0x66c   : > { %v1528_v10 = vpop.f32.mrf.mxu1 }
 0x66d   : > { %v1471_v11 = vpop.f32.mrf.mxu2 }
 0x66e   : > { %v1968_v9 = vpack.i.bf16 %v1471_v11, %v1509_v5 }
 0x66f   : > { %v1490_v12 = vpop.f32.mrf.mxu3 }
 0x670   : > { %v1975_v14 = vpack.i.bf16 %v1490_v12, %v1528_v10  ;;  %1969 = vxpose.xlu0.b32.start.end [1/1] (short) (narrow) %v1968_v9, 8 }
 0x672   : > { %1976 = vxpose.xlu1.b32.start.end [1/1] (short) (narrow) %v1975_v14, 8  ;;  %v1511_v15 = vpop.f32.mrf.mxu0 }
 0x674   : > { %v1530_v16 = vpop.f32.mrf.mxu1 }
 0x675   : > { %v1473_v13 = vpop.f32.mrf.mxu2 }
 0x677   : > { %v1492_v17 = vpop.f32.mrf.mxu3 }
 0x714   : > { %v1970_v18 = vpop.trf.xlu0 }
 0x715   : > { %v1974_v19 = vunpack.i.h.bf16 %v1970_v18  ;;  %v1971_v20 = vunpack.i.l.bf16 %v1970_v18 }
 0x716   : > { %v1977_v21 = vpop.trf.xlu1 }
 0x717   : > { %v1662_v3 = vrot.slane %v1974_v19, 4  ;;  %v1660_v22 = vrot.slane %v1971_v20, 4  ;;  %v1981_v6 = vunpack.i.h.bf16 %v1977_v21  ;;  %v1978_v23 = vunpack.i.l.bf16 %v1977_v21 }
 0x719   : > { %v1661_v2 = vsel %vm258_vm1, %v1660_v22, %v1974_v19  ;;  %v1663_v7 = vsel %vm258_vm1, %v1971_v20, %v1662_v3  ;;  %v1674_v24 = vrot.slane %v1981_v6, 4  ;;  %v1672_v27 = vrot.slane %v1978_v23, 4 }
 0x71a   : > { %v1667_v8 = vperm.slane %v1661_v2, %v2085_v26  ;;  %v1671_v25 = vperm.slane %v1663_v7, %v2085_v26 }
 0x71b   : > { %v1675_v28 = vsel %vm258_vm1, %v1978_v23, %v1674_v24  ;;  %v1673_v31 = vsel %vm258_vm1, %v1672_v27, %v1981_v6 }
 0x71c   : > { %v1686_v29 = vrot.slane %v1667_v8, 4  ;;  %v1698_v30 = vrot.slane %v1671_v25, 4  ;;  %v1683_v40 = vperm.slane %v1675_v28, %v2085_v26  ;;  %v1679_v57 = vperm.slane %v1673_v31, %v2085_v26 }
 0x71e   : > { %v1696_v32 = vrot.slane %v1683_v40, 4  ;;  %v1699_v33 = vsel %vm258_vm1, %v1683_v40, %v1698_v30  ;;  %v1684_v35 = vrot.slane %v1679_v57, 4  ;;  %v1687_v36 = vsel %vm258_vm1, %v1679_v57, %v1686_v29 }
 0x71f   : > { %v1707_v37 = vperm.slane %v1699_v33, %v2092_v34  ;;  %v1695_v38 = vperm.slane %v1687_v36, %v2092_v34 }
 0x720   : > { %v1697_v39 = vsel %vm258_vm1, %v1696_v32, %v1671_v25  ;;  %v1685_v41 = vsel %vm258_vm1, %v1684_v35, %v1667_v8 }
 0x721   : > { %v1703_v42 = vperm.slane %v1697_v39, %v2092_v34  ;;  %v1714_v43 = vrot.slane %v1707_v37, 4  ;;  %v1691_v44 = vperm.slane %v1685_v41, %v2092_v34  ;;  %v1710_v45 = vrot.slane %v1695_v38, 4 }
 0x723   : > { %v1712_v46 = vrot.slane %v1703_v42, 4  ;;  %v1715_v47 = vsel %vm258_vm1, 0.0, %v1714_v43  ;;  %v1727_v48 = vsel %vm258_vm1, %v1714_v43, %v1703_v42  ;;  %v1711_v49 = vsel %vm258_vm1, 0.0, %v1710_v45 }
 0x724   : > { %v1708_v50 = vrot.slane %v1691_v44, 4  ;;  %v1716_v51 = vsel %vm258_vm1, %v1710_v45, %v1691_v44  ;;  %v1731_v52 = vperm.slane %v1727_v48, %v2085_v26  ;;  %v1721_v55 = vrot.slane %v1711_v49, 4 }
 0x725   : > { %v1713_v53 = vsel %vm258_vm1, 0.0, %v1712_v46  ;;  %v1720_v54 = vperm.slane %v1716_v51, %v2085_v26  ;;  %v1732_v56 = vrot.slane %v1715_v47, 4 }
 0x726   : > { %v1709_v58 = vsel %vm258_vm1, 0.0, %v1708_v50  ;;  %v1752_v59 = vrot.slane %v1731_v52, 4 }
 0x727   : > { %v1722_v60 = vsel %vm258_vm1, %v1721_v55, %v1709_v58  ;;  %v1733_v61 = vsel %vm258_vm1, %v1732_v56, %v1713_v53  ;;  %v1740_v62 = vrot.slane %v1720_v54, 4 }
 0x728   : > { %v1726_v63 = vperm.slane %v1722_v60, %v2085_v26  ;;  %v1737_v0 = vperm.slane %v1733_v61, %v2085_v26 }
 0x72a   : > { %v1741_v1 = vsel %vm258_vm1, %v1726_v63, %v1740_v62  ;;  %v1753_v4 = vsel %vm258_vm1, %v1737_v0, %v1752_v59  ;;  %v1738_v5 = vrot.slane %v1726_v63, 4  ;;  %v1750_v10 = vrot.slane %v1737_v0, 4 }
 0x72b   : > { %v1749_v11 = vperm.slane %v1741_v1, %v2092_v34  ;;  %v1761_v9 = vperm.slane %v1753_v4, %v2092_v34 }
 0x72c   : > { %v1739_v12 = vsel %vm258_vm1, %v1738_v5, %v1720_v54  ;;  %v1751_v14 = vsel %vm258_vm1, %v1750_v10, %v1731_v52 }
 0x72d   : > { %v1768_v15 = vrot.slane %v1749_v11, 4  ;;  %v1766_v16 = vrot.slane %v1761_v9, 4  ;;  %v1745_v13 = vperm.slane %v1739_v12, %v2092_v34  ;;  %v1757_v26 = vperm.slane %v1751_v14, %v2092_v34 }
 0x72f   : > { %v1769_v17 = vsel %vm258_vm1, %v1761_v9, %v1768_v15  ;;  %v1767_v18 = vsel %vm258_vm1, %v1766_v16, %v1749_v11  ;;  %v1762_v19 = vrot.slane %v1757_v26, 4  ;;  %v1764_v20 = vrot.slane %v1745_v13, 4 }
 0x730   : > { %1779 = vrot.lane.b32.xlu1 %v1769_v17, %s2015_s11  ;;  %1775 = vrot.lane.b32.xlu0 %v1767_v18, %s2016_s12 }
 0x731   : > { %v1765_v21 = vsel %vm258_vm1, %v1757_v26, %v1764_v20  ;;  %v1763_v3 = vsel %vm258_vm1, %v1762_v19, %v1745_v13 }
 0x732   : > { %1771 = vrot.lane.b32.xlu2 %v1765_v21, %s2017_s13 }
 0x78c   : > { %v1772_v22 = vpop.permute.xlu2 %1771 }
 0x78d   : > { %v1782_v34 = vsel %vm934_vm3, %v1763_v3, %v1772_v22 }
 0x7a2   : > { %v1780_v6 = vpop.permute.xlu1 %1779  ;;  %v1776_v23 = vpop.permute.xlu0 %1775 }
 0x7a3   : > { %v1784_v2 = vsel %vm1783_vm4, %v1782_v34, %v1776_v23 }
 0x7a4   : > { %v1786_v7 = vsel %vm1785_vm5, %v1784_v2, %v1780_v6 }
 0x7a5   : > { %v1787_v24 = vpack.c.bf16 %v1786_v7, %v1786_v7 }
 0x7a7   : > { %1789 = vst.msk [vmem:[%s206_s18] sm:$0xf] %vm1788_vm6, %v1787_v24 }
 0x7a8 PF: > { %s14_s15 = sadd.s32 1, %s2006_s15  }
 0x7a9   : > { %p11_p4 = scmp.ge.s32.totalorder %s14_s15, 4  }
 0x7ab   :  { %13 = sbr.rel (!%p11_p4) target bundleno = 1 (0x1), region = 69 }

// kernel: multi_task_bert_forward.11
= control target key start
LH: loop header
LB: loop body
LE: loop exit
PB: predicated region body
PF: predicated region fallthrough
CT: control target
= control target key end

     0   :  { %vm29_vm0 = vcmask 261120   ;;  %v286_v11 = vmov 0.0   ;;  %vm127_vm1 = vcmask 523264   ;;  %v287_v50 = vmov 32.0   ;;  %s379_s1 = inlined_call_operand.vmem [shape: bf16[32,64], index: 1, kind: input, shape index: {}]   ;;  %s380_s2 = inlined_call_operand.vmem [shape: f32[1,64], index: 2, kind: input, shape index: {}]   ;;  %s381_s0 = inlined_call_operand.vmem [shape: bf16[16,32], index: 0, kind: input, shape index: {}]   ;;  %s382_s3 = inlined_call_operand.vmem [shape: bf16[64,32], index: 3, kind: input, shape index: {}]   ;;  %s383_s4 = inlined_call_operand.vmem [shape: f32[1,32], index: 4, kind: input, shape index: {}]   ;;  %s384_s5 = inlined_call_operand.vmem [shape: f32[1,32], index: 5, kind: input, shape index: {}]   ;;  %s385_s6 = inlined_call_operand.vmem [shape: f32[1,32], index: 6, kind: input, shape index: {}]   ;;  %s386_s7 = inlined_call_operand.vmem [shape: bf16[16,32], index: 7, kind: output, shape index: {}]  }
   0x1   :  { %v265_v0 = vld [vmem:[%s379_s1 + $0x8] sm:$0xff]  ;;  %v264_v1 = vld [vmem:[%s379_s1] sm:$0xff]  ;;  %v269_v3 = vld [vmem:[%s382_s3 + $0x18] sm:$0xff]  ;;  %30 = vst.msk [vmem:[#allocation2] sm:$0xff] %vm29_vm0, %v286_v11  ;;  %vm226_vm7 = vcmask 257024  }
   0x2   :  { %66 = vmatpush.bf16.msra.mxu0 %v265_v0  ;;  %v263_v2 = vld [vmem:[%s381_s0] sm:$0xff]  ;;  %135 = vmatpush.bf16.msra.mxu1 %v269_v3  ;;  %v268_v4 = vld [vmem:[%s382_s3 + $0x10] sm:$0xff]  ;;  %v267_v5 = vld [vmem:[%s382_s3 + $0x8] sm:$0xff]  ;;  %31 = vst.msk [vmem:[#allocation2 + $0x8] sm:$0xff] %vm29_vm0, %v286_v11 }
   0x3   :  { %v266_v6 = vld [vmem:[%s382_s3] sm:$0xff] }
   0x4   :  { %v272_v7 = vld [vmem:[%s380_s2] ss:$0 sm:$0xff] }
   0x5   :  { %v27_v36 = vld [vmem:[%s381_s0] sm:$0xff]  }
   0x6   :  { %67 = vmatpush.bf16.msra.mxu0 %v264_v1  ;;  %136 = vmatpush.bf16.msra.mxu1 %v268_v4  ;;  %v273_v37 = vld [vmem:[%s383_s4] ss:$0 sm:$0xff]  ;;  %v157_v40 = vunpack.c.l.bf16 %v27_v36  ;;  %v158_v45 = vunpack.c.h.bf16 %v27_v36 }
   0x8   :  { %v92_v32 = vld [vmem:[#allocation2] sm:$0xff] }
   0x9   :  { %245 = vmatmul.msk.bf16.vlgmr.msra.gmra.mxu0 %vm29_vm0, %v263_v2  ;;  %v93_v35 = vld [vmem:[#allocation2 + $0x8] sm:$0xff] }
   0xa   :  { %137 = vmatpush.bf16.msra.mxu1 %v267_v5 }
   0xe   :  { %138 = vmatpush.bf16.msra.mxu1 %v266_v6 }
  0x86   :  { %v69_v8 = vpop.f32.mrf.mxu0 }
  0x87   :  { %v70_v9 = vadd.f32 %v272_v7, %v69_v8 }
  0x89   :  { %v76_v10 = vmul.f32 0.044715, %v70_v9  ;;  %v74_v26 = vmul.f32 0.5, %v70_v9 }
  0x8b   :  { %v78_v12 = vmul.f32 %v76_v10, %v70_v9 }
  0x8d   :  { %v80_v13 = vmul.f32 %v78_v12, %v70_v9 }
  0x8e   :  { %v71_v14 = vpop.f32.mrf.mxu0 }
  0x8f   :  { %v72_v15 = vadd.f32 %v272_v7, %v71_v14  ;;  %v82_v16 = vadd.f32 %v80_v13, %v70_v9 }
  0x91   :  { %v77_v17 = vmul.f32 0.044715, %v72_v15  ;;  %v84_v19 = vmul.f32 0.7978846, %v82_v16  ;;  %v75_v27 = vmul.f32 0.5, %v72_v15 }
  0x93   :  { %v79_v18 = vmul.f32 %v77_v17, %v72_v15  ;;  %276 = vtanh.f32 %v84_v19  ;;  %v274_v17 = vld [vmem:[%s384_s5] ss:$0 sm:$0xff] }
  0x95   :  { %v81_v20 = vmul.f32 %v79_v18, %v72_v15 }
  0x97   :  { %v83_v21 = vadd.f32 %v81_v20, %v72_v15  ;;  %v275_v20 = vld [vmem:[%s385_s6] ss:$0 sm:$0xff] }
  0x99   :  { %v85_v22 = vmul.f32 0.7978846, %v83_v21  ;;  %v277_v23 = vpop.eup %276 }
  0x9a   :  { %v88_v24 = vadd.f32 1.0, %v277_v23 }
  0x9b   :  { %278 = vtanh.f32 %v85_v22 }
  0x9c   :  { %v90_v29 = vmul.f32 %v88_v24, %v74_v26  ;;  %280 = vrcp.f32 %v287_v50 }
  0xa1   :  { %v279_v25 = vpop.eup %278 }
  0xa2   :  { %v89_v28 = vadd.f32 1.0, %v279_v25  ;;  %v281_v51 = vpop.eup %280 }
  0xa3   :  { %v170_v52 = vmul.f32 32.0, %v281_v51  ;;  %vm174_vm2 = vweird.f32 %v281_v51 }
  0xa4   :  { %v91_v30 = vmul.f32 %v89_v28, %v75_v27 }
  0xa5   :  { %v171_v53 = vsub.f32 1.0, %v170_v52 }
  0xa6   :  { %v94_v31 = vpack.c.bf16 %v91_v30, %v90_v29 }
  0xa7   :  { %v172_v54 = vmul.f32 %v281_v51, %v171_v53 }
  0xa8   :  { %262 = vmatmul.msk.bf16.vlgmr.msra.gmra.mxu1 %vm127_vm1, %v94_v31 }
  0xa9   :  { %v173_v55 = vadd.f32 %v281_v51, %v172_v54 }
  0xab   :  { %v175_v56 = vsel %vm174_vm2, %v281_v51, %v173_v55 }
 0x125   :  { %v140_v33 = vpop.f32.mrf.mxu1 }
 0x126   :  { %v145_v34 = vadd.f32 %v140_v33, %v92_v32 }
 0x128   :  { %147 = vst.msk [vmem:[#allocation2] sm:$0xff] %vm29_vm0, %v145_v34 }
 0x12d   :  { %v142_v38 = vpop.f32.mrf.mxu1 }
 0x12e   :  { %v146_v39 = vadd.f32 %v142_v38, %v93_v35 }
 0x12f   :  { %v149_v41 = vld [vmem:[#allocation2] sm:$0xff] }
 0x130   :  { %148 = vst.msk [vmem:[#allocation2 + $0x8] sm:$0xff] %vm29_vm0, %v146_v39  ;;  %v155_v42 = vadd.f32 %v273_v37, %v149_v41 }
 0x132   :  { %v159_v43 = vadd.f32 %v157_v40, %v155_v42 }
 0x134   :  { %v163_v44 = vsel %vm29_vm0, %v159_v43, 0.0 }
 0x135   :  { %164 = vadd.xlane.f32.xlu0 %v163_v44 }
 0x137   :  { %v150_v46 = vld [vmem:[#allocation2 + $0x8] sm:$0xff] }
 0x138   :  { %v156_v47 = vadd.f32 %v273_v37, %v150_v46 }
 0x13a   :  { %v160_v48 = vadd.f32 %v158_v45, %v156_v47 }
 0x13c   :  { %v166_v49 = vsel %vm29_vm0, %v160_v48, 0.0 }
 0x13d   :  { %167 = vadd.xlane.f32.xlu0 %v166_v49 }
 0x1a8   :  { %v165_v57 = vpop.xlane.xlu0 %164 }
 0x1a9   :  { %v176_v58 = vmul.f32 %v175_v56, %v165_v57 }
 0x1ab   :  { %v178_v59 = vsub.f32 %v159_v43, %v176_v58 }
 0x1ad   :  { %v180_v60 = vmul.f32 %v178_v59, %v178_v59 }
 0x1af   :  { %v182_v61 = vsel %vm29_vm0, %v180_v60, 0.0 }
 0x1b0   :  { %183 = vadd.xlane.f32.xlu1 %v182_v61  ;;  %v168_v62 = vpop.xlane.xlu0 %167 }
 0x1b1   :  { %v177_v63 = vmul.f32 %v175_v56, %v168_v62 }
 0x1b3   :  { %v179_v0 = vsub.f32 %v160_v48, %v177_v63 }
 0x1b5   :  { %v181_v1 = vmul.f32 %v179_v0, %v179_v0 }
 0x1b7   :  { %v185_v2 = vsel %vm29_vm0, %v181_v1, 0.0 }
 0x1b8   :  { %186 = vadd.xlane.f32.xlu1 %v185_v2 }
 0x223   :  { %v184_v3 = vpop.xlane.xlu1 %183 }
 0x224   :  { %v188_v4 = vmul.f32 %v184_v3, %v175_v56 }
 0x226   :  { %v190_v5 = vadd.f32 1e-12, %v188_v4 }
 0x228   :  { %282 = vrsqrt.f32 %v190_v5  ;;  %vm198_vm4 = vweird.f32 %v190_v5 }
 0x22b   :  { %v187_v6 = vpop.xlane.xlu1 %186 }
 0x22c   :  { %v189_v7 = vmul.f32 %v187_v6, %v175_v56 }
 0x22e   :  { %v283_v8 = vpop.eup %282  ;;  %v191_v9 = vadd.f32 1e-12, %v189_v7 }
 0x22f   :  { %v193_v10 = vmul.f32 %v283_v8, %v190_v5  ;;  %vm199_vm3 = vweird.f32 %v283_v8 }
 0x230   :  { %284 = vrsqrt.f32 %v191_v9  ;;  %vm200_vm5 = vmor %vm198_vm4, %vm199_vm3  ;;  %vm208_vm8 = vweird.f32 %v191_v9 }
 0x231   :  { %v194_v11 = vmul.f32 %v283_v8, %v193_v10 }
 0x233   :  { %v195_v12 = vmul.f32 0.5, %v194_v11 }
 0x235   :  { %v196_v13 = vsub.f32 1.5, %v195_v12 }
 0x236   :  { %v285_v14 = vpop.eup %284 }
 0x237   :  { %v197_v15 = vmul.f32 %v283_v8, %v196_v13  ;;  %v203_v16 = vmul.f32 %v285_v14, %v191_v9  ;;  %vm209_vm6 = vweird.f32 %v285_v14 }
 0x238   :  { %vm210_vm9 = vmor %vm208_vm8, %vm209_vm6 }
 0x239   :  { %v201_v18 = vsel %vm200_vm5, %v283_v8, %v197_v15  ;;  %v204_v19 = vmul.f32 %v285_v14, %v203_v16 }
 0x23a   :  { %v212_v21 = vmul.f32 %v201_v18, %v178_v59 }
 0x23b   :  { %v205_v22 = vmul.f32 0.5, %v204_v19 }
 0x23c   :  { %v217_v23 = vmul.f32 %v274_v17, %v212_v21 }
 0x23d   :  { %v206_v24 = vsub.f32 1.5, %v205_v22 }
 0x23e   :  { %v222_v25 = vadd.f32 %v275_v20, %v217_v23 }
 0x23f   :  { %v207_v26 = vmul.f32 %v285_v14, %v206_v24 }
 0x240   :  { %v224_v27 = vpack.c.bf16 %v222_v25, %v222_v25 }
 0x241   :  { %v211_v28 = vsel %vm210_vm9, %v285_v14, %v207_v26 }
 0x242   :  { %227 = vst.msk [vmem:[%s386_s7] sm:$0xf] %vm226_vm7, %v224_v27  ;;  %v213_v29 = vmul.f32 %v211_v28, %v179_v0 }
 0x244   :  { %v218_v30 = vmul.f32 %v274_v17, %v213_v29 }
 0x246   :  { %v223_v31 = vadd.f32 %v275_v20, %v218_v30 }
 0x248   :  { %v225_v32 = vpack.c.bf16 %v223_v31, %v223_v31 }
 0x24a   :  { %228 = vst.msk [vmem:[%s386_s7 + $0x4] sm:$0xf] %vm226_vm7, %v225_v32 }

// kernel: multi_task_bert_forward.15
= control target key start
LH: loop header
LB: loop body
LE: loop exit
PB: predicated region body
PF: predicated region fallthrough
CT: control target
= control target key end

     0   :  { %vm42_vm0 = vcmask 261120   ;;  %vm97_vm1 = vcmask 9216   ;;  %s183_s1 = inlined_call_operand.vmem [shape: bf16[32,32], index: 1, kind: input, shape index: {}]   ;;  %s184_s2 = inlined_call_operand.vmem [shape: f32[1,32], index: 2, kind: input, shape index: {}]   ;;  %s185_s0 = inlined_call_operand.vmem [shape: bf16[2,32], index: 0, kind: input, shape index: {}]   ;;  %s186_s4 = inlined_call_operand.vmem [shape: f32[1,2], index: 4, kind: input, shape index: {}]   ;;  %s187_s3 = inlined_call_operand.vmem [shape: bf16[32,2], index: 3, kind: input, shape index: {}]   ;;  %s188_s5 = inlined_call_operand.vmem [shape: f32[2,2], index: 5, kind: output, shape index: {}]  }
   0x1   :  { %v122_v0 = vld [vmem:[%s183_s1 + $0x8] sm:$0xff]  ;;  %v121_v1 = vld [vmem:[%s183_s1] sm:$0xff] }
   0x2   :  { %52 = vmatpush.bf16.msra.mxu0 %v122_v0  ;;  %v21_v2 = vld [vmem:[%s185_s0] sm:$0x1]  ;;  %v124_v3 = vld [vmem:[%s187_s3 + $0x8] sm:$0xff] }
   0x3   :  { %90 = vmatpush.bf16.msra.mxu1 %v124_v3  ;;  %v123_v4 = vld [vmem:[%s187_s3] sm:$0xff] }
   0x4   :  { %v125_v5 = vld [vmem:[%s184_s2] ss:$0 sm:$0xff] }
   0x5   :  { %v126_v11 = vld [vmem:[%s186_s4] ss:$0 sm:$0xff] }
   0x6   :  { %53 = vmatpush.bf16.msra.mxu0 %v121_v1 }
   0x7   :  { %91 = vmatpush.bf16.msra.mxu1 %v123_v4 }
   0x9   :  { %111 = vmatmul.msk.bf16.vlgmr.msra.gmra.mxu0 %vm42_vm0, %v21_v2 }
  0x86   :  { %v55_v6 = vpop.f32.mrf.mxu0 }
  0x87   :  { %v56_v7 = vadd.f32 %v125_v5, %v55_v6 }
  0x89   :  { %127 = vtanh.f32 %v56_v7 }
  0x8e   :  { %v57_v8 = vpop.f32.mrf.mxu0 }
  0x8f   :  { %v128_v9 = vpop.eup %127 }
  0x90   :  { %v60_v10 = vpack.c.bf16 %v128_v9, %v128_v9 }
  0x92   :  { %120 = vmatmul.msk.bf16.vlgmr.msra.gmra.mxu1 %vm42_vm0, %v60_v10 }
 0x10f   :  { %v93_v12 = vpop.f32.mrf.mxu1 }
 0x110   :  { %v94_v13 = vadd.f32 %v126_v11, %v93_v12 }
 0x112   :  { %98 = vst.msk [vmem:[%s188_s5] sm:$0x3] %vm97_vm1, %v94_v13 }
 0x117   :  { %v95_v14 = vpop.f32.mrf.mxu1 }

</bundles_post_ra>
